<compile_context>
chip_gen: v5e
topology: v5e:2x2
jax: 0.10.0
libtpu: 0.0.40
codegen_flags: <defaults>
</compile_context>

<pallas_src>
import functools

import jax
import jax.numpy as jnp
import numpy as np
from jax.experimental import pallas as pl
from jax.experimental.pallas import tpu as pltpu


# ---------------- fused Pallas kernel ----------------

def _fused_mhha_kernel(q_ref, k_ref, v_ref, wk_ref, wv_ref, wsm_ref, sp_ref,
                       o_ref, kp_buf, vp_buf,
                       *, segs, n_heads, dim_proj, n_seg_rows, scale, eps):
    """Fused forward for one batch element (grid axis = batch, "parallel").

    segs: static tuple of (kernel_size, seg_len, tap_offset, len_offset).
    q_ref            : (Q, dim_m)          (batch dim squeezed by BlockSpec)
    k_ref / v_ref    : (S, dim_m)
    wk_ref / wv_ref  : (dim_m, T_taps*HP)  packed per-tap conv weights
    wsm_ref          : (dim_m + HP, >=HP)  rows [0:dim_m]   -> Wq (dim_m, HP)
                                           rows [dim_m: ]   -> Wo (HP, dim_m)
    sp_ref           : (8, 128) packed small vectors:
                         row 0                      : bq   (HP)
                         rows 1..n_seg_rows         : bk   (HP) per segment
                         rows 1+n_seg_rows..        : bv   (HP) per segment
                         row 1+2*n_seg_rows         : bo   (dim_m)
                         row 2+2*n_seg_rows         : gamma(dim_m)
                         row 3+2*n_seg_rows         : beta (dim_m)
    kp_buf / vp_buf  : VMEM (L_total, HP) scratch for the concatenated segments.
    """
    Q, dm = q_ref.shape
    HP = n_heads * dim_proj
    n_live = len(segs)
    del n_live  # (segments actually used; prefix of the packed layout)

    # Load activations once; q2 doubles as the residual.
    q2 = q_ref[...]                       # (Q, dm)
    k2 = k_ref[...]                       # (S, dm)
    v2 = v_ref[...]                       # (S, dm)

    # Packed projection / output weights (static sublane-aligned slices).
    wq = wsm_ref[0:dm, 0:HP]              # (dm, HP)
    wo = wsm_ref[dm:dm + HP, 0:dm]        # (HP, dm)

    # Packed small vectors.
    bq = sp_ref[0:1, 0:HP]                # (1, HP)
    r_bo = 1 + 2 * n_seg_rows
    bo = sp_ref[r_bo:r_bo + 1, 0:dm]      # (1, dm)
    gamma = sp_ref[r_bo + 1:r_bo + 2, 0:dm]
    beta = sp_ref[r_bo + 2:r_bo + 3, 0:dm]

    # ---- query projection: one (Q, dm) @ (dm, HP) matmul ----
    qp = jnp.dot(q2, wq, preferred_element_type=jnp.float32) + bq      # (Q, HP)

    # ---- key / value projections: one lane-dense N = T_taps*HP matmul each ----
    pk = jnp.dot(k2, wk_ref[...], preferred_element_type=jnp.float32)  # (S, T*HP)
    pv = jnp.dot(v2, wv_ref[...], preferred_element_type=jnp.float32)

    # ---- conv segment assembly: sublane-shifted column-block sums (VPU) ----
    for seg_idx, (kk, seg_len, tap_off, len_off) in enumerate(segs):
        bk = sp_ref[1 + seg_idx:2 + seg_idx, 0:HP]
        bv = sp_ref[1 + n_seg_rows + seg_idx:2 + n_seg_rows + seg_idx, 0:HP]
        c0 = tap_off * HP
        k_acc = pk[0:seg_len, c0:c0 + HP]
        v_acc = pv[0:seg_len, c0:c0 + HP]
        for j in range(1, kk):
            cj = (tap_off + j) * HP
            k_acc = k_acc + pk[j:j + seg_len, cj:cj + HP]
            v_acc = v_acc + pv[j:j + seg_len, cj:cj + HP]
        kp_buf[len_off:len_off + seg_len, :] = k_acc + bk
        vp_buf[len_off:len_off + seg_len, :] = v_acc + bv

    kp = kp_buf[...]                      # (L_total, HP)
    vp = vp_buf[...]

    # ---- per-head attention with the output linear fused into the loop ----
    out_acc = jnp.zeros((Q, dm), jnp.float32)
    for h in range(n_heads):
        sl = slice(h * dim_proj, (h + 1) * dim_proj)
        qh = qp[:, sl]                    # (Q, P)
        kh = kp[:, sl]                    # (L, P)
        vh = vp[:, sl]                    # (L, P)
        s = jax.lax.dot_general(qh, kh, (((1,), (1,)), ((), ())),
                                preferred_element_type=jnp.float32) * scale
        s = s - jnp.max(s, axis=-1, keepdims=True)
        e = jnp.exp(s)
        attn = e / jnp.sum(e, axis=-1, keepdims=True)     # exact softmax
        ctx = jnp.dot(attn, vh, preferred_element_type=jnp.float32)    # (Q, P)
        out_acc = out_acc + jnp.dot(ctx, wo[sl, :],
                                    preferred_element_type=jnp.float32)

    # ---- output bias + residual + LayerNorm ----
    # TODO(synk): nn.Dropout is applied as identity (inference-mode semantics);
    #             masked=True (autoregressive mask) path is not implemented.
    x = out_acc + bo + q2                                  # (Q, dm)
    mean = jnp.mean(x, axis=-1, keepdims=True)
    var = jnp.mean((x - mean) ** 2, axis=-1, keepdims=True)
    y = (x - mean) * jax.lax.rsqrt(var + eps)
    o_ref[...] = (y * gamma + beta).astype(o_ref.dtype)


def multi_head_heterogeneous_attention(value, key, query, packed, active_ks,
                                        n_heads, dim_proj, eps=1e-12):
    """Forward pass (masked=False, eval-mode dropout) -- one fused pallas_call."""
    B, Q, dm = query.shape
    S = key.shape[1]
    HP = n_heads * dim_proj

    # Mirror the `break` in calculate_conv_heads: skip kernel sizes > seq_len.
    segs = []
    tap_off = 0
    len_off = 0
    for k in active_ks:
        if S < k:
            break
        seg_len = S - k + 1
        segs.append((k, seg_len, tap_off, len_off))
        tap_off += k
        len_off += seg_len
    if not segs:
        raise ValueError("sequence shorter than every convolution kernel size")
    segs = tuple(segs)
    l_total = len_off
    n_seg_rows = packed["n_segs"]                       # packed bias-row layout
    t_taps = packed["wk_all"].shape[1] // HP

    kernel = functools.partial(
        _fused_mhha_kernel, segs=segs, n_heads=n_heads, dim_proj=dim_proj,
        n_seg_rows=n_seg_rows, scale=float(dim_proj) ** -0.5, eps=eps)

    args = (query, key, value,
            packed["wk_all"], packed["wv_all"],
            packed["w_small"], packed["small"])

    flops = 2 * B * (Q * dm * HP                       # query projection
                     + 2 * S * dm * t_taps * HP        # packed k/v projections
                     + n_heads * (2 * Q * l_total * dim_proj   # scores + ctx
                                  + Q * dim_proj * dm))        # output linear
    transcendentals = B * n_heads * Q * l_total        # softmax exp
    bytes_accessed = sum(int(a.size) * a.dtype.itemsize for a in args) \
        + B * Q * dm * 4

    in_specs = [
        pl.BlockSpec((None, Q, dm), lambda b: (b, 0, 0)),   # query
        pl.BlockSpec((None, S, dm), lambda b: (b, 0, 0)),   # key
        pl.BlockSpec((None, S, dm), lambda b: (b, 0, 0)),   # value
        pl.BlockSpec(packed["wk_all"].shape, lambda b: (0, 0)),
        pl.BlockSpec(packed["wv_all"].shape, lambda b: (0, 0)),
        pl.BlockSpec(packed["w_small"].shape, lambda b: (0, 0)),
        pl.BlockSpec(packed["small"].shape, lambda b: (0, 0)),
    ]

    return pl.pallas_call(
        kernel,
        out_shape=jax.ShapeDtypeStruct((B, Q, dm), jnp.float32),
        grid=(B,),
        in_specs=in_specs,
        out_specs=pl.BlockSpec((None, Q, dm), lambda b: (b, 0, 0)),
        scratch_shapes=[
            pltpu.VMEM((l_total, HP), jnp.float32),     # concatenated key proj
            pltpu.VMEM((l_total, HP), jnp.float32),     # concatenated val proj
        ],
        compiler_params=pltpu.CompilerParams(
            dimension_semantics=("parallel",),          # 2nd TensorCore on v7x
            vmem_limit_bytes=32 * 1024 * 1024),
        cost_estimate=pl.CostEstimate(
            flops=flops, transcendentals=transcendentals,
            bytes_accessed=bytes_accessed),
    )(*args)


# ---------------- parameter construction (PyTorch-equivalent layout) ----------------

def conv_params_to_taps(w, b, n_heads, dim_m, dim_proj, k):
    """PyTorch grouped Conv1d weight (n_heads*dim_proj, dim_m, k) ->
    per-tap matmul weights (k, dim_m, n_heads*dim_proj), bias (1, n_heads*dim_proj).
    Column order is head-major (h*dim_proj + p), matching torch.cat of head splits."""
    w4 = w.reshape(n_heads, dim_proj, dim_m, k)
    w_taps = jnp.transpose(w4, (3, 2, 0, 1)).reshape(k, dim_m, n_heads * dim_proj)
    return w_taps, b.reshape(1, n_heads * dim_proj)


def init_params(rng, dim_m, dim_proj, head_convs, n_heads):
    active_ks = [k for k, c in enumerate(head_convs, 1) if c != 0]
    keys = iter(jax.random.split(rng, 4 + 4 * len(active_ks)))
    HP = n_heads * dim_proj

    def conv_w(kk, k):
        return 0.2 * jax.random.normal(kk, (HP, dim_m, k), jnp.float32)

    def conv_b(kk):
        return 0.1 * jax.random.normal(kk, (HP,), jnp.float32)

    p = {}
    # query projection: single kernel-size-1 grouped conv
    wq_taps, bq = conv_params_to_taps(conv_w(next(keys), 1), conv_b(next(keys)),
                                      n_heads, dim_m, dim_proj, 1)
    p["wq"] = wq_taps[0]                       # (dim_m, HP)
    p["bq"] = bq                               # (1, HP)

    wk_list, bk_list, wv_list, bv_list = [], [], [], []
    for k in active_ks:
        wt, bt = conv_params_to_taps(conv_w(next(keys), k), conv_b(next(keys)),
                                     n_heads, dim_m, dim_proj, k)
        wk_list.append(wt)
        bk_list.append(bt)
        wt, bt = conv_params_to_taps(conv_w(next(keys), k), conv_b(next(keys)),
                                     n_heads, dim_m, dim_proj, k)
        wv_list.append(wt)
        bv_list.append(bt)
    p["wk_taps"] = jnp.concatenate(wk_list, axis=0)      # (T_taps, dim_m, HP)
    p["bk"] = jnp.stack(bk_list, axis=0)                 # (n_segs, 1, HP)
    p["wv_taps"] = jnp.concatenate(wv_list, axis=0)
    p["bv"] = jnp.stack(bv_list, axis=0)

    wo = 0.2 * jax.random.normal(next(keys), (dim_m, HP), jnp.float32)  # nn.Linear (out, in)
    bo = 0.1 * jax.random.normal(next(keys), (dim_m,), jnp.float32)
    p["wo"] = jnp.transpose(wo)                # (HP, dim_m)
    p["bo"] = bo.reshape(1, dim_m)
    p["gamma"] = jnp.ones((1, dim_m), jnp.float32)       # nn.LayerNorm default init
    p["beta"] = jnp.zeros((1, dim_m), jnp.float32)
    return p, tuple(active_ks)


def pack_params(params, n_heads, dim_proj, dim_m):
    """Pack logical params into the few lane-dense operands the kernel takes."""
    HP = n_heads * dim_proj
    n_segs = int(params["bk"].shape[0])

    # All conv taps side by side: (dim_m, T_taps*HP) — one matmul per tensor.
    wk_all = jnp.transpose(params["wk_taps"], (1, 0, 2)).reshape(dim_m, -1)
    wv_all = jnp.transpose(params["wv_taps"], (1, 0, 2)).reshape(dim_m, -1)

    # Wq / Wo stacked into one slab: rows [0:dm] = Wq, rows [dm:dm+HP] = Wo.
    wcols = max(HP, dim_m)
    w_small = jnp.zeros((dim_m + HP, wcols), jnp.float32)
    w_small = w_small.at[:dim_m, :HP].set(params["wq"])
    w_small = w_small.at[dim_m:, :dim_m].set(params["wo"])

    # Six tiny vectors packed into one (rows, 128) slab.
    pw = ((max(HP, dim_m) + 127) // 128) * 128
    rows = 4 + 2 * n_segs
    rows_pad = ((rows + 7) // 8) * 8
    sp = jnp.zeros((rows_pad, pw), jnp.float32)
    sp = sp.at[0, :HP].set(params["bq"][0])
    for i in range(n_segs):
        sp = sp.at[1 + i, :HP].set(params["bk"][i, 0])
        sp = sp.at[1 + n_segs + i, :HP].set(params["bv"][i, 0])
    r = 1 + 2 * n_segs
    sp = sp.at[r, :dim_m].set(params["bo"][0])
    sp = sp.at[r + 1, :dim_m].set(params["gamma"][0])
    sp = sp.at[r + 2, :dim_m].set(params["beta"][0])

    return {"wk_all": wk_all, "wv_all": wv_all, "w_small": w_small,
            "small": sp, "n_segs": n_segs}


# ---------------- pure-jnp reference (same PyTorch semantics) ----------------

def reference_forward(value, key, query, params, active_ks, n_heads, dim_proj,
                      eps=1e-12):
    hi = jax.lax.Precision.HIGHEST
    B, Q, dm = query.shape
    S = key.shape[1]
    HP = n_heads * dim_proj
    scale = float(dim_proj) ** -0.5

    def proj_multi(x, w_taps, biases):
        outs = []
        tap_off = 0
        for seg_idx, k in enumerate(active_ks):
            if S < k:
                break
            L = S - k + 1
            y = sum(jnp.einsum("bld,dp->blp", x[:, j:j + L, :],
                               w_taps[tap_off + j], precision=hi)
                    for j in range(k)) + biases[seg_idx]
            outs.append(y)
            tap_off += k
        return jnp.concatenate(outs, axis=1)

    qp = jnp.einsum("bqd,dp->bqp", query, params["wq"], precision=hi) + params["bq"]
    kp = proj_multi(key, params["wk_taps"], params["bk"])
    vp = proj_multi(value, params["wv_taps"], params["bv"])
    Lt = kp.shape[1]

    q4 = qp.reshape(B, Q, n_heads, dim_proj)
    k4 = kp.reshape(B, Lt, n_heads, dim_proj)
    v4 = vp.reshape(B, Lt, n_heads, dim_proj)
    s = jnp.einsum("bqhp,blhp->bhql", q4, k4, precision=hi) * scale
    attn = jax.nn.softmax(s, axis=-1)
    ctx = jnp.einsum("bhql,blhp->bqhp", attn, v4, precision=hi).reshape(B, Q, HP)
    out = jnp.einsum("bqp,pd->bqd", ctx, params["wo"], precision=hi) + params["bo"]
    x = out + query
    mean = jnp.mean(x, axis=-1, keepdims=True)
    var = jnp.mean((x - mean) ** 2, axis=-1, keepdims=True)
    y = (x - mean) / jnp.sqrt(var + eps)
    return y * params["gamma"] + params["beta"]


if __name__ == "__main__":
    dim_m, dim_proj, n_heads = 32, 16, 4
    head_convs_cfg = (1, 0, 3)                  # module argument
    # module maps nonzero entries -> n_heads
    head_convs = tuple(0 if c == 0 else n_heads for c in head_convs_cfg)
    batch, seq_len = 2, 16

    root = jax.random.PRNGKey(0)
    k_p, k_v, k_k, k_q = jax.random.split(root, 4)
    params, active_ks = init_params(k_p, dim_m, dim_proj, head_convs, n_heads)
    packed = pack_params(params, n_heads, dim_proj, dim_m)

    value = jax.random.normal(k_v, (batch, seq_len, dim_m), jnp.float32)
    key_t = jax.random.normal(k_k, (batch, seq_len, dim_m), jnp.float32)
    query = jax.random.normal(k_q, (batch, seq_len, dim_m), jnp.float32)

    out = multi_head_heterogeneous_attention(value, key_t, query, packed,
                                             active_ks, n_heads, dim_proj)
    out = jax.block_until_ready(out)
    assert out.shape == (batch, seq_len, dim_m)

    ref = reference_forward(value, key_t, query, params, active_ks,
                            n_heads, dim_proj)
    np.testing.assert_allclose(np.asarray(out), np.asarray(ref),
                               rtol=2e-3, atol=2e-3)
    print("KERNEL_OK")
</pallas_src>

<mosaic_0001>
module attributes {stable_mosaic.version = 11 : i64} {
  func.func @_fused_mhha_kernel(%arg0: i32, %arg1: memref<1x16x32xf32, #tpu.memory_space<vmem>>, %arg2: memref<1x16x32xf32, #tpu.memory_space<vmem>>, %arg3: memref<1x16x32xf32, #tpu.memory_space<vmem>>, %arg4: memref<32x256xf32, #tpu.memory_space<vmem>>, %arg5: memref<32x256xf32, #tpu.memory_space<vmem>>, %arg6: memref<96x64xf32, #tpu.memory_space<vmem>>, %arg7: memref<8x128xf32, #tpu.memory_space<vmem>>, %arg8: memref<1x16x32xf32, #tpu.memory_space<vmem>>, %arg9: memref<30x64xf32, #tpu.memory_space<vmem>>, %arg10: memref<30x64xf32, #tpu.memory_space<vmem>>) attributes {dimension_semantics = [#tpu.dimension_semantics<parallel>], iteration_bounds = array<i64: 2>, scalar_prefetch = 0 : i64, scratch_operands = 2 : i64, tpu.core_type = #tpu.core_type<tc>, window_params = [{transform_indices = @transform_0, window_bounds = array<i64: 1, 16, 32>}, {transform_indices = @transform_1, window_bounds = array<i64: 1, 16, 32>}, {transform_indices = @transform_2, window_bounds = array<i64: 1, 16, 32>}, {pipeline_mode = #tpu.pipeline_mode<synchronous>, transform_indices = @transform_3, window_bounds = array<i64: 32, 256>}, {pipeline_mode = #tpu.pipeline_mode<synchronous>, transform_indices = @transform_4, window_bounds = array<i64: 32, 256>}, {pipeline_mode = #tpu.pipeline_mode<synchronous>, transform_indices = @transform_5, window_bounds = array<i64: 96, 64>}, {pipeline_mode = #tpu.pipeline_mode<synchronous>, transform_indices = @transform_6, window_bounds = array<i64: 8, 128>}, {transform_indices = @transform_7, window_bounds = array<i64: 1, 16, 32>}]} {
    %c0 = arith.constant 0 : index
    %c0_0 = arith.constant 0 : index
    %c0_1 = arith.constant 0 : index
    %0 = vector.load %arg1[%c0, %c0_0, %c0_1] : memref<1x16x32xf32, #tpu.memory_space<vmem>>, vector<1x16x32xf32>
    %1 = vector.shape_cast %0 : vector<1x16x32xf32> to vector<16x32xf32>
    %c0_2 = arith.constant 0 : index
    %c0_3 = arith.constant 0 : index
    %c0_4 = arith.constant 0 : index
    %2 = vector.load %arg2[%c0_2, %c0_3, %c0_4] : memref<1x16x32xf32, #tpu.memory_space<vmem>>, vector<1x16x32xf32>
    %3 = vector.shape_cast %2 : vector<1x16x32xf32> to vector<16x32xf32>
    %c0_5 = arith.constant 0 : index
    %c0_6 = arith.constant 0 : index
    %c0_7 = arith.constant 0 : index
    %4 = vector.load %arg3[%c0_5, %c0_6, %c0_7] : memref<1x16x32xf32, #tpu.memory_space<vmem>>, vector<1x16x32xf32>
    %5 = vector.shape_cast %4 : vector<1x16x32xf32> to vector<16x32xf32>
    %c0_8 = arith.constant 0 : index
    %c0_9 = arith.constant 0 : index
    %6 = vector.load %arg6[%c0_8, %c0_9] : memref<96x64xf32, #tpu.memory_space<vmem>>, vector<32x64xf32>
    %c32 = arith.constant 32 : index
    %c0_10 = arith.constant 0 : index
    %7 = vector.load %arg6[%c32, %c0_10] : memref<96x64xf32, #tpu.memory_space<vmem>>, vector<64x32xf32>
    %c0_11 = arith.constant 0 : index
    %c0_12 = arith.constant 0 : index
    %8 = vector.load %arg7[%c0_11, %c0_12] : memref<8x128xf32, #tpu.memory_space<vmem>>, vector<1x64xf32>
    %c5 = arith.constant 5 : index
    %c0_13 = arith.constant 0 : index
    %9 = vector.load %arg7[%c5, %c0_13] : memref<8x128xf32, #tpu.memory_space<vmem>>, vector<1x32xf32>
    %c6 = arith.constant 6 : index
    %c0_14 = arith.constant 0 : index
    %10 = vector.load %arg7[%c6, %c0_14] : memref<8x128xf32, #tpu.memory_space<vmem>>, vector<1x32xf32>
    %c7 = arith.constant 7 : index
    %c0_15 = arith.constant 0 : index
    %11 = vector.load %arg7[%c7, %c0_15] : memref<8x128xf32, #tpu.memory_space<vmem>>, vector<1x32xf32>
    %cst = arith.constant dense<0.000000e+00> : vector<16x64xf32>
    %12 = tpu.matmul %1, %6, %cst {dimension_numbers = #tpu.dot_dimension_numbers<[1], [0], [0], [1], [0, 0, 1, 1], [], []>} : vector<16x32xf32>, vector<32x64xf32>, vector<16x64xf32> -> vector<16x64xf32>
    %13 = vector.broadcast %8 : vector<1x64xf32> to vector<16x64xf32>
    %14 = arith.addf %12, %13 : vector<16x64xf32>
    %c0_16 = arith.constant 0 : index
    %c0_17 = arith.constant 0 : index
    %15 = vector.load %arg4[%c0_16, %c0_17] : memref<32x256xf32, #tpu.memory_space<vmem>>, vector<32x256xf32>
    %cst_18 = arith.constant dense<0.000000e+00> : vector<16x256xf32>
    %16 = tpu.matmul %3, %15, %cst_18 {dimension_numbers = #tpu.dot_dimension_numbers<[1], [0], [0], [1], [0, 0, 1, 1], [], []>} : vector<16x32xf32>, vector<32x256xf32>, vector<16x256xf32> -> vector<16x256xf32>
    %c0_19 = arith.constant 0 : index
    %c0_20 = arith.constant 0 : index
    %17 = vector.load %arg5[%c0_19, %c0_20] : memref<32x256xf32, #tpu.memory_space<vmem>>, vector<32x256xf32>
    %cst_21 = arith.constant dense<0.000000e+00> : vector<16x256xf32>
    %18 = tpu.matmul %5, %17, %cst_21 {dimension_numbers = #tpu.dot_dimension_numbers<[1], [0], [0], [1], [0, 0, 1, 1], [], []>} : vector<16x32xf32>, vector<32x256xf32>, vector<16x256xf32> -> vector<16x256xf32>
    %c1 = arith.constant 1 : index
    %c0_22 = arith.constant 0 : index
    %19 = vector.load %arg7[%c1, %c0_22] : memref<8x128xf32, #tpu.memory_space<vmem>>, vector<1x64xf32>
    %c3 = arith.constant 3 : index
    %c0_23 = arith.constant 0 : index
    %20 = vector.load %arg7[%c3, %c0_23] : memref<8x128xf32, #tpu.memory_space<vmem>>, vector<1x64xf32>
    %21 = vector.extract_strided_slice %16 {offsets = [0, 0], sizes = [16, 64], strides = [1, 1]} : vector<16x256xf32> to vector<16x64xf32>
    %22 = vector.extract_strided_slice %18 {offsets = [0, 0], sizes = [16, 64], strides = [1, 1]} : vector<16x256xf32> to vector<16x64xf32>
    %23 = vector.broadcast %19 : vector<1x64xf32> to vector<16x64xf32>
    %24 = arith.addf %21, %23 : vector<16x64xf32>
    %c0_24 = arith.constant 0 : index
    %c0_25 = arith.constant 0 : index
    %25 = vector.load %arg9[%c0_24, %c0_25] : memref<30x64xf32, #tpu.memory_space<vmem>>, vector<16x64xf32>
    tpu.vector_store %arg9[%c0_24, %c0_25], %24 {strides = array<i32>} : memref<30x64xf32, #tpu.memory_space<vmem>>, vector<16x64xf32>,
    %26 = vector.broadcast %20 : vector<1x64xf32> to vector<16x64xf32>
    %27 = arith.addf %22, %26 : vector<16x64xf32>
    %c0_26 = arith.constant 0 : index
    %c0_27 = arith.constant 0 : index
    %28 = vector.load %arg10[%c0_26, %c0_27] : memref<30x64xf32, #tpu.memory_space<vmem>>, vector<16x64xf32>
    tpu.vector_store %arg10[%c0_26, %c0_27], %27 {strides = array<i32>} : memref<30x64xf32, #tpu.memory_space<vmem>>, vector<16x64xf32>,
    %c2 = arith.constant 2 : index
    %c0_28 = arith.constant 0 : index
    %29 = vector.load %arg7[%c2, %c0_28] : memref<8x128xf32, #tpu.memory_space<vmem>>, vector<1x64xf32>
    %c4 = arith.constant 4 : index
    %c0_29 = arith.constant 0 : index
    %30 = vector.load %arg7[%c4, %c0_29] : memref<8x128xf32, #tpu.memory_space<vmem>>, vector<1x64xf32>
    %31 = vector.extract_strided_slice %16 {offsets = [0, 64], sizes = [14, 64], strides = [1, 1]} : vector<16x256xf32> to vector<14x64xf32>
    %32 = vector.extract_strided_slice %18 {offsets = [0, 64], sizes = [14, 64], strides = [1, 1]} : vector<16x256xf32> to vector<14x64xf32>
    %33 = vector.extract_strided_slice %16 {offsets = [1, 128], sizes = [14, 64], strides = [1, 1]} : vector<16x256xf32> to vector<14x64xf32>
    %34 = arith.addf %31, %33 : vector<14x64xf32>
    %35 = vector.extract_strided_slice %18 {offsets = [1, 128], sizes = [14, 64], strides = [1, 1]} : vector<16x256xf32> to vector<14x64xf32>
    %36 = arith.addf %32, %35 : vector<14x64xf32>
    %37 = vector.extract_strided_slice %16 {offsets = [2, 192], sizes = [14, 64], strides = [1, 1]} : vector<16x256xf32> to vector<14x64xf32>
    %38 = arith.addf %34, %37 : vector<14x64xf32>
    %39 = vector.extract_strided_slice %18 {offsets = [2, 192], sizes = [14, 64], strides = [1, 1]} : vector<16x256xf32> to vector<14x64xf32>
    %40 = arith.addf %36, %39 : vector<14x64xf32>
    %41 = vector.broadcast %29 : vector<1x64xf32> to vector<14x64xf32>
    %42 = arith.addf %38, %41 : vector<14x64xf32>
    %c16 = arith.constant 16 : index
    %c0_30 = arith.constant 0 : index
    %43 = vector.load %arg9[%c16, %c0_30] : memref<30x64xf32, #tpu.memory_space<vmem>>, vector<14x64xf32>
    tpu.vector_store %arg9[%c16, %c0_30], %42 {strides = array<i32>} : memref<30x64xf32, #tpu.memory_space<vmem>>, vector<14x64xf32>,
    %44 = vector.broadcast %30 : vector<1x64xf32> to vector<14x64xf32>
    %45 = arith.addf %40, %44 : vector<14x64xf32>
    %c16_31 = arith.constant 16 : index
    %c0_32 = arith.constant 0 : index
    %46 = vector.load %arg10[%c16_31, %c0_32] : memref<30x64xf32, #tpu.memory_space<vmem>>, vector<14x64xf32>
    tpu.vector_store %arg10[%c16_31, %c0_32], %45 {strides = array<i32>} : memref<30x64xf32, #tpu.memory_space<vmem>>, vector<14x64xf32>,
    %c0_33 = arith.constant 0 : index
    %c0_34 = arith.constant 0 : index
    %47 = vector.load %arg9[%c0_33, %c0_34] : memref<30x64xf32, #tpu.memory_space<vmem>>, vector<30x64xf32>
    %c0_35 = arith.constant 0 : index
    %c0_36 = arith.constant 0 : index
    %48 = vector.load %arg10[%c0_35, %c0_36] : memref<30x64xf32, #tpu.memory_space<vmem>>, vector<30x64xf32>
    %cst_37 = arith.constant 0.000000e+00 : f32
    %49 = vector.broadcast %cst_37 : f32 to vector<16x32xf32>
    %50 = vector.extract_strided_slice %14 {offsets = [0, 0], sizes = [16, 16], strides = [1, 1]} : vector<16x64xf32> to vector<16x16xf32>
    %51 = vector.extract_strided_slice %47 {offsets = [0, 0], sizes = [30, 16], strides = [1, 1]} : vector<30x64xf32> to vector<30x16xf32>
    %52 = vector.extract_strided_slice %48 {offsets = [0, 0], sizes = [30, 16], strides = [1, 1]} : vector<30x64xf32> to vector<30x16xf32>
    %cst_38 = arith.constant dense<0.000000e+00> : vector<16x30xf32>
    %53 = tpu.matmul %50, %51, %cst_38 {dimension_numbers = #tpu.dot_dimension_numbers<[1], [1], [0], [0], [0, 0, 1, 0], [], []>} : vector<16x16xf32>, vector<30x16xf32>, vector<16x30xf32> -> vector<16x30xf32>
    %cst_39 = arith.constant 2.500000e-01 : f32
    %54 = vector.broadcast %cst_39 : f32 to vector<16x30xf32>
    %55 = arith.mulf %53, %54 : vector<16x30xf32>
    %cst_40 = arith.constant dense<0xFF800000> : vector<16xf32>
    %56 = vector.multi_reduction <maximumf>, %55, %cst_40 [1] : vector<16x30xf32> to vector<16xf32>
    %57 = vector.shape_cast %56 : vector<16xf32> to vector<16x1xf32>
    %58 = vector.broadcast %57 : vector<16x1xf32> to vector<16x30xf32>
    %59 = arith.subf %55, %58 : vector<16x30xf32>
    %60 = math.exp %59 : vector<16x30xf32>
    %cst_41 = arith.constant dense<0.000000e+00> : vector<16xf32>
    %61 = vector.multi_reduction <add>, %60, %cst_41 [1] : vector<16x30xf32> to vector<16xf32>
    %62 = vector.shape_cast %61 : vector<16xf32> to vector<16x1xf32>
    %63 = vector.broadcast %62 : vector<16x1xf32> to vector<16x30xf32>
    %64 = arith.divf %60, %63 : vector<16x30xf32>
    %cst_42 = arith.constant dense<0.000000e+00> : vector<16x16xf32>
    %65 = tpu.matmul %64, %52, %cst_42 {dimension_numbers = #tpu.dot_dimension_numbers<[1], [0], [0], [1], [0, 0, 1, 1], [], []>} : vector<16x30xf32>, vector<30x16xf32>, vector<16x16xf32> -> vector<16x16xf32>
    %66 = vector.extract_strided_slice %7 {offsets = [0, 0], sizes = [16, 32], strides = [1, 1]} : vector<64x32xf32> to vector<16x32xf32>
    %cst_43 = arith.constant dense<0.000000e+00> : vector<16x32xf32>
    %67 = tpu.matmul %65, %66, %cst_43 {dimension_numbers = #tpu.dot_dimension_numbers<[1], [0], [0], [1], [0, 0, 1, 1], [], []>} : vector<16x16xf32>, vector<16x32xf32>, vector<16x32xf32> -> vector<16x32xf32>
    %68 = arith.addf %49, %67 : vector<16x32xf32>
    %69 = vector.extract_strided_slice %14 {offsets = [0, 16], sizes = [16, 16], strides = [1, 1]} : vector<16x64xf32> to vector<16x16xf32>
    %70 = vector.extract_strided_slice %47 {offsets = [0, 16], sizes = [30, 16], strides = [1, 1]} : vector<30x64xf32> to vector<30x16xf32>
    %71 = vector.extract_strided_slice %48 {offsets = [0, 16], sizes = [30, 16], strides = [1, 1]} : vector<30x64xf32> to vector<30x16xf32>
    %cst_44 = arith.constant dense<0.000000e+00> : vector<16x30xf32>
    %72 = tpu.matmul %69, %70, %cst_44 {dimension_numbers = #tpu.dot_dimension_numbers<[1], [1], [0], [0], [0, 0, 1, 0], [], []>} : vector<16x16xf32>, vector<30x16xf32>, vector<16x30xf32> -> vector<16x30xf32>
    %cst_45 = arith.constant 2.500000e-01 : f32
    %73 = vector.broadcast %cst_45 : f32 to vector<16x30xf32>
    %74 = arith.mulf %72, %73 : vector<16x30xf32>
    %cst_46 = arith.constant dense<0xFF800000> : vector<16xf32>
    %75 = vector.multi_reduction <maximumf>, %74, %cst_46 [1] : vector<16x30xf32> to vector<16xf32>
    %76 = vector.shape_cast %75 : vector<16xf32> to vector<16x1xf32>
    %77 = vector.broadcast %76 : vector<16x1xf32> to vector<16x30xf32>
    %78 = arith.subf %74, %77 : vector<16x30xf32>
    %79 = math.exp %78 : vector<16x30xf32>
    %cst_47 = arith.constant dense<0.000000e+00> : vector<16xf32>
    %80 = vector.multi_reduction <add>, %79, %cst_47 [1] : vector<16x30xf32> to vector<16xf32>
    %81 = vector.shape_cast %80 : vector<16xf32> to vector<16x1xf32>
    %82 = vector.broadcast %81 : vector<16x1xf32> to vector<16x30xf32>
    %83 = arith.divf %79, %82 : vector<16x30xf32>
    %cst_48 = arith.constant dense<0.000000e+00> : vector<16x16xf32>
    %84 = tpu.matmul %83, %71, %cst_48 {dimension_numbers = #tpu.dot_dimension_numbers<[1], [0], [0], [1], [0, 0, 1, 1], [], []>} : vector<16x30xf32>, vector<30x16xf32>, vector<16x16xf32> -> vector<16x16xf32>
    %85 = vector.extract_strided_slice %7 {offsets = [16, 0], sizes = [16, 32], strides = [1, 1]} : vector<64x32xf32> to vector<16x32xf32>
    %cst_49 = arith.constant dense<0.000000e+00> : vector<16x32xf32>
    %86 = tpu.matmul %84, %85, %cst_49 {dimension_numbers = #tpu.dot_dimension_numbers<[1], [0], [0], [1], [0, 0, 1, 1], [], []>} : vector<16x16xf32>, vector<16x32xf32>, vector<16x32xf32> -> vector<16x32xf32>
    %87 = arith.addf %68, %86 : vector<16x32xf32>
    %88 = vector.extract_strided_slice %14 {offsets = [0, 32], sizes = [16, 16], strides = [1, 1]} : vector<16x64xf32> to vector<16x16xf32>
    %89 = vector.extract_strided_slice %47 {offsets = [0, 32], sizes = [30, 16], strides = [1, 1]} : vector<30x64xf32> to vector<30x16xf32>
    %90 = vector.extract_strided_slice %48 {offsets = [0, 32], sizes = [30, 16], strides = [1, 1]} : vector<30x64xf32> to vector<30x16xf32>
    %cst_50 = arith.constant dense<0.000000e+00> : vector<16x30xf32>
    %91 = tpu.matmul %88, %89, %cst_50 {dimension_numbers = #tpu.dot_dimension_numbers<[1], [1], [0], [0], [0, 0, 1, 0], [], []>} : vector<16x16xf32>, vector<30x16xf32>, vector<16x30xf32> -> vector<16x30xf32>
    %cst_51 = arith.constant 2.500000e-01 : f32
    %92 = vector.broadcast %cst_51 : f32 to vector<16x30xf32>
    %93 = arith.mulf %91, %92 : vector<16x30xf32>
    %cst_52 = arith.constant dense<0xFF800000> : vector<16xf32>
    %94 = vector.multi_reduction <maximumf>, %93, %cst_52 [1] : vector<16x30xf32> to vector<16xf32>
    %95 = vector.shape_cast %94 : vector<16xf32> to vector<16x1xf32>
    %96 = vector.broadcast %95 : vector<16x1xf32> to vector<16x30xf32>
    %97 = arith.subf %93, %96 : vector<16x30xf32>
    %98 = math.exp %97 : vector<16x30xf32>
    %cst_53 = arith.constant dense<0.000000e+00> : vector<16xf32>
    %99 = vector.multi_reduction <add>, %98, %cst_53 [1] : vector<16x30xf32> to vector<16xf32>
    %100 = vector.shape_cast %99 : vector<16xf32> to vector<16x1xf32>
    %101 = vector.broadcast %100 : vector<16x1xf32> to vector<16x30xf32>
    %102 = arith.divf %98, %101 : vector<16x30xf32>
    %cst_54 = arith.constant dense<0.000000e+00> : vector<16x16xf32>
    %103 = tpu.matmul %102, %90, %cst_54 {dimension_numbers = #tpu.dot_dimension_numbers<[1], [0], [0], [1], [0, 0, 1, 1], [], []>} : vector<16x30xf32>, vector<30x16xf32>, vector<16x16xf32> -> vector<16x16xf32>
    %104 = vector.extract_strided_slice %7 {offsets = [32, 0], sizes = [16, 32], strides = [1, 1]} : vector<64x32xf32> to vector<16x32xf32>
    %cst_55 = arith.constant dense<0.000000e+00> : vector<16x32xf32>
    %105 = tpu.matmul %103, %104, %cst_55 {dimension_numbers = #tpu.dot_dimension_numbers<[1], [0], [0], [1], [0, 0, 1, 1], [], []>} : vector<16x16xf32>, vector<16x32xf32>, vector<16x32xf32> -> vector<16x32xf32>
    %106 = arith.addf %87, %105 : vector<16x32xf32>
    %107 = vector.extract_strided_slice %14 {offsets = [0, 48], sizes = [16, 16], strides = [1, 1]} : vector<16x64xf32> to vector<16x16xf32>
    %108 = vector.extract_strided_slice %47 {offsets = [0, 48], sizes = [30, 16], strides = [1, 1]} : vector<30x64xf32> to vector<30x16xf32>
    %109 = vector.extract_strided_slice %48 {offsets = [0, 48], sizes = [30, 16], strides = [1, 1]} : vector<30x64xf32> to vector<30x16xf32>
    %cst_56 = arith.constant dense<0.000000e+00> : vector<16x30xf32>
    %110 = tpu.matmul %107, %108, %cst_56 {dimension_numbers = #tpu.dot_dimension_numbers<[1], [1], [0], [0], [0, 0, 1, 0], [], []>} : vector<16x16xf32>, vector<30x16xf32>, vector<16x30xf32> -> vector<16x30xf32>
    %cst_57 = arith.constant 2.500000e-01 : f32
    %111 = vector.broadcast %cst_57 : f32 to vector<16x30xf32>
    %112 = arith.mulf %110, %111 : vector<16x30xf32>
    %cst_58 = arith.constant dense<0xFF800000> : vector<16xf32>
    %113 = vector.multi_reduction <maximumf>, %112, %cst_58 [1] : vector<16x30xf32> to vector<16xf32>
    %114 = vector.shape_cast %113 : vector<16xf32> to vector<16x1xf32>
    %115 = vector.broadcast %114 : vector<16x1xf32> to vector<16x30xf32>
    %116 = arith.subf %112, %115 : vector<16x30xf32>
    %117 = math.exp %116 : vector<16x30xf32>
    %cst_59 = arith.constant dense<0.000000e+00> : vector<16xf32>
    %118 = vector.multi_reduction <add>, %117, %cst_59 [1] : vector<16x30xf32> to vector<16xf32>
    %119 = vector.shape_cast %118 : vector<16xf32> to vector<16x1xf32>
    %120 = vector.broadcast %119 : vector<16x1xf32> to vector<16x30xf32>
    %121 = arith.divf %117, %120 : vector<16x30xf32>
    %cst_60 = arith.constant dense<0.000000e+00> : vector<16x16xf32>
    %122 = tpu.matmul %121, %109, %cst_60 {dimension_numbers = #tpu.dot_dimension_numbers<[1], [0], [0], [1], [0, 0, 1, 1], [], []>} : vector<16x30xf32>, vector<30x16xf32>, vector<16x16xf32> -> vector<16x16xf32>
    %123 = vector.extract_strided_slice %7 {offsets = [48, 0], sizes = [16, 32], strides = [1, 1]} : vector<64x32xf32> to vector<16x32xf32>
    %cst_61 = arith.constant dense<0.000000e+00> : vector<16x32xf32>
    %124 = tpu.matmul %122, %123, %cst_61 {dimension_numbers = #tpu.dot_dimension_numbers<[1], [0], [0], [1], [0, 0, 1, 1], [], []>} : vector<16x16xf32>, vector<16x32xf32>, vector<16x32xf32> -> vector<16x32xf32>
    %125 = arith.addf %106, %124 : vector<16x32xf32>
    %126 = vector.broadcast %9 : vector<1x32xf32> to vector<16x32xf32>
    %127 = arith.addf %125, %126 : vector<16x32xf32>
    %128 = arith.addf %127, %1 : vector<16x32xf32>
    %cst_62 = arith.constant dense<0.000000e+00> : vector<16xf32>
    %129 = vector.multi_reduction <add>, %128, %cst_62 [1] : vector<16x32xf32> to vector<16xf32>
    %130 = vector.shape_cast %129 : vector<16xf32> to vector<16x1xf32>
    %cst_63 = arith.constant 3.200000e+01 : f32
    %131 = vector.broadcast %cst_63 : f32 to vector<16x1xf32>
    %132 = arith.divf %130, %131 : vector<16x1xf32>
    %133 = vector.broadcast %132 : vector<16x1xf32> to vector<16x32xf32>
    %134 = arith.subf %128, %133 : vector<16x32xf32>
    %135 = arith.mulf %134, %134 : vector<16x32xf32>
    %cst_64 = arith.constant dense<0.000000e+00> : vector<16xf32>
    %136 = vector.multi_reduction <add>, %135, %cst_64 [1] : vector<16x32xf32> to vector<16xf32>
    %137 = vector.shape_cast %136 : vector<16xf32> to vector<16x1xf32>
    %cst_65 = arith.constant 3.200000e+01 : f32
    %138 = vector.broadcast %cst_65 : f32 to vector<16x1xf32>
    %139 = arith.divf %137, %138 : vector<16x1xf32>
    %140 = vector.broadcast %132 : vector<16x1xf32> to vector<16x32xf32>
    %141 = arith.subf %128, %140 : vector<16x32xf32>
    %cst_66 = arith.constant 9.99999996E-13 : f32
    %142 = vector.broadcast %cst_66 : f32 to vector<16x1xf32>
    %143 = arith.addf %139, %142 : vector<16x1xf32>
    %144 = math.rsqrt %143 : vector<16x1xf32>
    %145 = vector.broadcast %144 : vector<16x1xf32> to vector<16x32xf32>
    %146 = arith.mulf %141, %145 : vector<16x32xf32>
    %147 = vector.broadcast %10 : vector<1x32xf32> to vector<16x32xf32>
    %148 = arith.mulf %146, %147 : vector<16x32xf32>
    %149 = vector.broadcast %11 : vector<1x32xf32> to vector<16x32xf32>
    %150 = arith.addf %148, %149 : vector<16x32xf32>
    %c0_67 = arith.constant 0 : index
    %c0_68 = arith.constant 0 : index
    %c0_69 = arith.constant 0 : index
    %151 = vector.load %arg8[%c0_67, %c0_68, %c0_69] : memref<1x16x32xf32, #tpu.memory_space<vmem>>, vector<1x16x32xf32>
    %152 = vector.shape_cast %151 : vector<1x16x32xf32> to vector<16x32xf32>
    %153 = vector.shape_cast %150 : vector<16x32xf32> to vector<1x16x32xf32>
    tpu.vector_store %arg8[%c0_67, %c0_68, %c0_69], %153 {strides = array<i32>} : memref<1x16x32xf32, #tpu.memory_space<vmem>>, vector<1x16x32xf32>,
    return
  }
  func.func @transform_0(%arg0: i32) -> (i32, i32, i32) {
    %c0_i32 = arith.constant 0 : i32
    %c0_i32_0 = arith.constant 0 : i32
    %c0_i32_1 = arith.constant 0 : i32
    return %arg0, %c0_i32, %c0_i32_0 : i32, i32, i32
  }
  func.func @transform_1(%arg0: i32) -> (i32, i32, i32) {
    %c0_i32 = arith.constant 0 : i32
    %c0_i32_0 = arith.constant 0 : i32
    %c0_i32_1 = arith.constant 0 : i32
    return %arg0, %c0_i32, %c0_i32_0 : i32, i32, i32
  }
  func.func @transform_2(%arg0: i32) -> (i32, i32, i32) {
    %c0_i32 = arith.constant 0 : i32
    %c0_i32_0 = arith.constant 0 : i32
    %c0_i32_1 = arith.constant 0 : i32
    return %arg0, %c0_i32, %c0_i32_0 : i32, i32, i32
  }
  func.func @transform_3(%arg0: i32) -> (i32, i32) {
    %c0_i32 = arith.constant 0 : i32
    %c0_i32_0 = arith.constant 0 : i32
    %c0_i32_1 = arith.constant 0 : i32
    return %c0_i32, %c0_i32_0 : i32, i32
  }
  func.func @transform_4(%arg0: i32) -> (i32, i32) {
    %c0_i32 = arith.constant 0 : i32
    %c0_i32_0 = arith.constant 0 : i32
    %c0_i32_1 = arith.constant 0 : i32
    return %c0_i32, %c0_i32_0 : i32, i32
  }
  func.func @transform_5(%arg0: i32) -> (i32, i32) {
    %c0_i32 = arith.constant 0 : i32
    %c0_i32_0 = arith.constant 0 : i32
    %c0_i32_1 = arith.constant 0 : i32
    return %c0_i32, %c0_i32_0 : i32, i32
  }
  func.func @transform_6(%arg0: i32) -> (i32, i32) {
    %c0_i32 = arith.constant 0 : i32
    %c0_i32_0 = arith.constant 0 : i32
    %c0_i32_1 = arith.constant 0 : i32
    return %c0_i32, %c0_i32_0 : i32, i32
  }
  func.func @transform_7(%arg0: i32) -> (i32, i32, i32) {
    %c0_i32 = arith.constant 0 : i32
    %c0_i32_0 = arith.constant 0 : i32
    %c0_i32_1 = arith.constant 0 : i32
    return %arg0, %c0_i32, %c0_i32_0 : i32, i32, i32
  }
}

</mosaic_0001>

<bundles_post_ra>
// kernel: tpu_custom_call.1
= control target key start
LH: loop header
LB: loop body
LE: loop exit
PB: predicated region body
PF: predicated region fallthrough
CT: control target
= control target key end

     0   :  { %s2433_s0 = inlined_call_operand.vmem [shape: f32[2,16,32], index: 0, kind: input, shape index: {}]   ;;  %s2434_s1 = inlined_call_operand.hbm [shape: f32[2,16,32], index: 1, kind: input, shape index: {}]   ;;  %s2435_s2 = inlined_call_operand.hbm [shape: f32[2,16,32], index: 2, kind: input, shape index: {}]   ;;  %s2436_s3 = inlined_call_operand.vmem [shape: f32[32,256], index: 3, kind: input, shape index: {}]   ;;  %s2437_s4 = inlined_call_operand.vmem [shape: f32[32,256], index: 4, kind: input, shape index: {}]   ;;  %s2438_s5 = inlined_call_operand.vmem [shape: f32[96,64], index: 5, kind: input, shape index: {}]   ;;  %s2439_s6 = inlined_call_operand.hbm [shape: f32[8,128], index: 6, kind: input, shape index: {}]   ;;  %s2440_s7 = inlined_call_operand.hbm [shape: f32[2,16,32], index: 7, kind: output, shape index: {}]  }
   0x1   :  { %2446 = sst [smem:[#allocation20_spill]] %s2439_s6 }
   0x2   :  { %12 = vsyncpa [#allocation5], 0 }
   0x3   :  { %14 = vsyncpa [#allocation5 + $0x1], 0 }
   0x4   :  { %15 = vsyncpa [#allocation8], 0 }
   0x5   :  { %17 = vsyncpa [#allocation8 + $0x1], 0 }
   0x6   :  { %18 = vsyncpa [#allocation6], 0 }
   0x7   :  { %20 = vsyncpa [#allocation6 + $0x1], 0  ;;  %s1943_s24 = smov 0   ;;  %s1945_s25 = smov 0  }
   0x8   :  { %s1947_s26 = smov 0   ;;  %s1949_s27 = smov 0  }
   0x9 LB: > { %2447 = sst [smem:[#allocation15_spill]] %s1879_s24  ;;  %s1964_s28 = sadd.s32 4294967295, %s1891_s27   ;;  %s1891_s27 = sphi %s1949_s27, %s2462_s27   ;;  %s1887_s26 = sphi %s1947_s26, %s2464_s26   ;;  %s1883_s25 = sphi %s1945_s25, %s2466_s25   ;;  %s1879_s24 = sphi %s1943_s24, %s2465_s24  }
   0xa   : > { %2448 = sst [smem:[#allocation16_spill]] %s1887_s26  ;;  %s1510_s29 = sadd.s32 4294967294, %s1891_s27  }
   0xb   : > { %s1968_s30 = sadd.s32 1, %s1891_s27   ;;  %s59_s8 = sadd.s32 1, %s1887_s26 }
   0xc   : > { %2449 = sst [smem:[#allocation17_spill]] %s1968_s30  ;;  %s56_s9 = ssub.s32 %s1891_s27, %s1968_s30 }
   0xd   : > { %p66_p0 = scmp.ne.s32.totalorder %s1887_s26, %s1883_s25  ;;  %p57_p1 = scmp.eq.s32.totalorder %s56_s9, 0 }
   0xe   : > { %p67_p2 = scmp.eq.s32.totalorder %s1891_s27, 0  ;;  %p72_p3 = scmp.ne.s32.totalorder %s1883_s25, %s1879_s24 }
   0xf   : > { %p73_p4 = scmp.eq.s32.totalorder %s1964_s28, 0  ;;  %p206_p7 = scmp.eq.s32.totalorder %s1964_s28, 1 }
  0x10   : > { %s1980_s10 = scalar_select %p57_p1, %s1887_s26, %s59_s8  }
  0x11   : > { %p1982_p5 = por %p67_p2, %p66_p0  ;;  %p1988_p6 = por %p73_p4, %p72_p3 }
  0x12   : > { %2450 = sst [smem:[#allocation18_spill]] %s1980_s10  ;;  %p212_p8 = scmp.eq.s32.totalorder %s1510_s29, 1 }
  0x13   : > { %p1511_p9 = scmp.ge.s32.totalorder %s1891_s27, 1  ;;  %p219_p10 = scmp.lt.s32.totalorder %s1891_s27, 3 }
  0x14   : > { %p1995_p11 = por %p206_p7, %p66_p0  ;;  %p1999_p12 = por %p212_p8, %p72_p3 }
  0x15   : > { %p2003_p13 = pnand %p1511_p9, %p219_p10  ;;  %s2457_s6 = sld [smem:[#allocation20_spill]] }
  0x16   : > { %s2454_s14 = scalar_select %p1999_p12, 1, 0 }
  0x17   : > { %p1604_p1 = pneg %p2003_p13  ;;  %s1893_s19 = smov [#allocation9]  }
  0x18   : > { %2455 = sst [smem:[#allocation19_spill]] %s2454_s14  ;;  %s242_s20 = sshll.u32 %s1893_s19, 4  ;;  %s243_s20 = int_to_ptr.vmem [resolvable:$true] %s242_s20 }
  0x19   : > { %p1605_p2 = pnand %p1604_p1, %p73_p4  ;;  %p1620_p3 = scmp.lt.s32.totalorder %s1891_s27, 2 }
  0x1a   : > { %s261_s21 = sand.u32 1, %s1887_s26   ;;  %s1586_s29 = sshll.u32 %s1891_s27, 4 }
  0x1b   : > { %s240_s18 = sshll.u32 %s2457_s6, 4  ;;  %p2019_p7 = pnand %p1620_p3, %p1982_p5  ;;  %s241_s18 = int_to_ptr.hbm [resolvable:$true] %s240_s18 }
  0x1c   : > { %1607 = dma.hbm_to_vmem [thread:$0]  (!%p1605_p2), %s241_s18, 128, %s243_s20, [#allocation8]  }
  0x1d   : > { %s2023_s23 = sshll.u32 %s261_s21, 4  ;;  %s270_s16 = scalar_lea.hbm %s2434_s1, %s1586_s29 }
  0x1e   : > { %s271_s17 = sshll.u32 %s270_s16, 4  ;;  %s265_s19 = scalar_lea.vmem [#allocation4], %s2023_s23  ;;  %s272_s17 = int_to_ptr.hbm [resolvable:$true] %s271_s17 }
  0x1f   : > { %s273_s6 = sshll.u32 %s265_s19, 4  ;;  %s262_s11 = scalar_lea.sflag [#allocation5], %s261_s21  ;;  %s274_s6 = int_to_ptr.vmem [resolvable:$true] %s273_s6 }
  0x20   : > { %s1757_s18 = sshra.s32 %s272_s17, 4  ;;  %p1761_p8 = pneg %p2019_p7  ;;  %s1758_s18 = int_to_ptr.hbm [resolvable:$true] %s1757_s18 }
  0x21   : > { %s1759_s20 = scalar_lea.hbm %s1758_s18, 16  ;;  %s1764_s8 = scalar_lea.hbm %s2434_s1, 32 }
  0x22   : > { %p1760_p5 = scmp.ne.s32.totalorder %s1758_s18, %s1759_s20  ;;  %p1765_p1 = scmp.lt.s32.totalorder %s1758_s18, %s2434_s1 }
  0x23   : > { %p1766_p2 = scmp.lt.s32.totalorder %s1764_s8, %s1759_s20 }
  0x24   : > { %p1762_p9 = pnand %p1761_p8, %p1760_p5 }
  0x25   : > { %p1767_p3 = por %p1766_p2, %p1765_p1 }
  0x26   : > { %p1763_p10 = pneg %p1762_p9 }
  0x28   : > { %p1768_p0 = pnand %p1767_p3, %p1763_p10 }
  0x2a   : > { %1771 = shalt.err (!%p1768_p0)
}
  0x2b   : > { %s1894_s21 = smov 128   ;;  %s1895_s19 = smov 8  }
  0x2c   : > { %1611 = dma.hbm_to_vmem [thread:$0]  (!%p2019_p7), %s272_s17, 256, %s274_s6, %s262_s11, %s1894_s21, %s1894_s21, %s1895_s19  }
  0x2d   : > { %s292_s26 = scalar_lea.hbm %s2435_s2, %s1586_s29  ;;  %s287_s24 = scalar_lea.vmem [#allocation7], %s2023_s23 }
  0x2e   : > { %s293_s10 = sshll.u32 %s292_s26, 4  ;;  %s295_s9 = sshll.u32 %s287_s24, 4  ;;  %s294_s10 = int_to_ptr.hbm [resolvable:$true] %s293_s10  ;;  %s296_s9 = int_to_ptr.vmem [resolvable:$true] %s295_s9 }
  0x2f   : > { %s283_s18 = sand.u32 1, %s1891_s27   ;;  %s1787_s8 = sshra.s32 %s294_s10, 4  ;;  %s1788_s8 = int_to_ptr.hbm [resolvable:$true] %s1787_s8 }
  0x30   : > { %s284_s20 = scalar_lea.sflag [#allocation8], %s283_s18  ;;  %s1789_s16 = scalar_lea.hbm %s1788_s8, 16 }
  0x31   : > { %p1790_p0 = scmp.ne.s32.totalorder %s1788_s8, %s1789_s16  ;;  %s1794_s30 = scalar_lea.hbm %s2435_s2, 32 }
  0x32   : > { %p1795_p10 = scmp.lt.s32.totalorder %s1788_s8, %s2435_s2  ;;  %p1796_p1 = scmp.lt.s32.totalorder %s1794_s30, %s1789_s16 }
  0x33   : > { %p1792_p5 = pnand %p1790_p0, %p1761_p8 }
  0x34   : > { %p1797_p2 = por %p1796_p1, %p1795_p10 }
  0x35   : > { %p1793_p9 = pneg %p1792_p5 }
  0x37   : > { %p1798_p3 = pnand %p1797_p2, %p1793_p9 }
  0x39   : > { %1801 = shalt.err (!%p1798_p3)
}
  0x3a   : > { %1614 = dma.hbm_to_vmem [thread:$0]  (!%p2019_p7), %s294_s10, 256, %s296_s9, %s284_s20, %s1894_s21, %s1894_s21, %s1895_s19  }
  0x3b   : > { %307 = sbr.rel (%p2003_p13) target bundleno = 1979 (0x7bb), region = 48  ;;  %s2062_s24 = sand.u32 (!%p2003_p13), 1, %s1883_s25  }
  0x3c   : > { %s2065_s23 = sshll.u32 (!%p2003_p13), %s2062_s24, 4  ;;  %s310_s11 = scalar_lea.sflag (!%p2003_p13), [#allocation5], %s2062_s24 }
  0x3d   : > { %s313_s26 = scalar_lea.vmem (!%p2003_p13), [#allocation4], %s2065_s23 }
  0x40   : > { %1862 = dma.done.wait (%p1988_p6), %s310_s11, 256  }
  0x41   : > { %1864 = vsyncadd (%p1988_p6), %s310_s11, 4294967040  ;;  %s319_s15 = sand.u32 1, %s1964_s28   ;;  %s323_s21 = scalar_lea.vmem [#allocation7], %s2065_s23 }
  0x42   : > { %s320_s22 = scalar_lea.sflag [#allocation8], %s319_s15 }
  0x43   : > { %1866 = dma.done.wait (%p1988_p6), %s320_s22, 256  }
  0x44   : > { %1868 = vsyncadd (%p1988_p6), %s320_s22, 4294967040 }
  0x45   : > { %1870 = dma.done.wait (%p73_p4), [#allocation8], 128  }
  0x46   : > { %1872 = vsyncadd (%p73_p4), [#allocation8], 4294967168  ;;  %p370_p13 = scmp.lt.s32.totalorder %s1964_s28, 1  ;;  %v435_v0 = vld [vmem:[%s2436_s3 + $0x38] sm:$0xff]  ;;  %v433_v1 = vld [vmem:[%s2436_s3 + $0x28] sm:$0xff]  ;;  %vm398_vm0 = vcmask 261120  }
  0x47   : > { %477 = vmatpush.msra.mxu2 %v435_v0  ;;  %v431_v2 = vld [vmem:[%s2436_s3 + $0x18] sm:$0xff]  ;;  %v383_v4 = vld [vmem:[%s2438_s5 + $0x10] sm:$0xff]  ;;  %v429_v5 = vld [vmem:[%s2436_s3 + $0x8] sm:$0xff]  ;;  %s1896_s11 = smov 64   ;;  %vm553_vm1 = vcmask 523264   ;;  %vm565_vm2 = vcmask 1046528  }
  0x48   : > { %s371_s19 = scalar_select %p370_p13, %s1964_s28, 1  ;;  %v384_v3 = vld [vmem:[%s2438_s5 + $0x18] sm:$0xff]  ;;  %v377_v6 = vld [vmem:[%s313_s26] sm:$0xff]  ;;  %v382_v7 = vld [vmem:[%s2438_s5 + $0x8] sm:$0xff]  ;;  %vm590_vm3 = vcmask 1045504   ;;  %vm621_vm4 = vcmask 521216  }
  0x49   : > { %478 = vmatpush.msra.mxu2 %v433_v1  ;;  %1590 = vmatpush.msra.mxu1 %v384_v3  ;;  %v381_v8 = vld [vmem:[%s2438_s5] sm:$0xff]  ;;  %v434_v10 = vld [vmem:[%s2436_s3 + $0x30] sm:$0xff]  ;;  %v378_v13 = vld [vmem:[%s313_s26 + $0x8] sm:$0xff]  ;;  %vm648_vm5 = vcmask 130048   ;;  %vm692_vm6 = vcmask 244736   ;;  %s1897_s26 = smov 112  }
  0x4a   : > { %s1588_s12 = sshll.u32 %s371_s19, 4  ;;  %417 = vmatpush.msra.mxu0 %v384_v3  ;;  %v432_v11 = vld [vmem:[%s2436_s3 + $0x20] sm:$0xff]  ;;  %v430_v12 = vld [vmem:[%s2436_s3 + $0x10] sm:$0xff]  ;;  %v495_v17 = vld [vmem:[%s2437_s4 + $0x38] sm:$0xff]  ;;  %s1898_s15 = smov 80  }
  0x4b   : > { %s2114_s20 = scalar_lea.vmem %s2433_s0, %s1588_s12  ;;  %479 = vmatpush.msra.mxu2 %v431_v2  ;;  %1591 = vmatpush.msra.mxu1 %v383_v4  ;;  %v428_v14 = vld [vmem:[%s2436_s3] sm:$0xff]  ;;  %v493_v18 = vld [vmem:[%s2437_s4 + $0x28] sm:$0xff]  ;;  %v491_v19 = vld [vmem:[%s2437_s4 + $0x18] sm:$0xff]  ;;  %s1899_s22 = smov 96  }
  0x4c   : > { %418 = vmatpush.msra.mxu0 %v383_v4  ;;  %v376_v9 = vld [vmem:[%s2114_s20 + $0x8] sm:$0xff]  ;;  %v1680_v15 = vld [vmem:[#allocation9 + $0x2] ss:$0 sm:$0xff]  ;;  %v1682_v25 = vld [vmem:[#allocation9 + $0x1] ss:$0 sm:$0xff]  ;;  %s369_s10 = scalar_lea.vmem [#allocation10], %s2065_s23 }
  0x4d   : > { %480 = vmatpush.msra.mxu2 %v429_v5  ;;  %1592 = vmatpush.msra.mxu1 %v382_v7  ;;  %v2138_v16 = vld [vmem:[%s2114_s20] sm:$0xff]  ;;  %v489_v20 = vld [vmem:[%s2437_s4 + $0x8] sm:$0xff]  ;;  %v494_v34 = vld [vmem:[%s2437_s4 + $0x30] sm:$0xff]  ;;  %s1390_s9 = sshll.u32 %s369_s10, 4  ;;  %s1837_s12 = scalar_lea.hbm %s2440_s7, 32  ;;  %s1391_s9 = int_to_ptr.vmem [resolvable:$true] %s1390_s9 }
  0x4e   : > { %1531 = vmatmul.msk.f32.vlgmr.msra.gmra.mxu2 %vm398_vm0, %v377_v6  ;;  %419 = vmatpush.msra.mxu0 %v382_v7  ;;  %v379_v21 = vld [vmem:[%s323_s21] sm:$0xff]  ;;  %v380_v24 = vld [vmem:[%s323_s21 + $0x8] sm:$0xff] }
  0x4f   : > { %1593 = vmatpush.msra.mxu1 %v381_v8  ;;  %607 = vrot.lane.b32.xlu1 %v1680_v15, %s1896_s11  ;;  %v492_v35 = vld [vmem:[%s2437_s4 + $0x20] sm:$0xff]  ;;  %v490_v36 = vld [vmem:[%s2437_s4 + $0x10] sm:$0xff] }
  0x50   : > { %1528 = vmatmul.msk.f32.vlgmr.msra.gmra.mxu1 %vm398_vm0, %v376_v9  ;;  %420 = vmatpush.msra.mxu0 %v381_v8  ;;  %v488_v37 = vld [vmem:[%s2437_s4] sm:$0xff] }
  0x51   : > { %454 = vmatpush.msrb.mxu1 %v434_v10  ;;  %1527 = vmatmul.msk.f32.vlgmr.msra.gmra.mxu0 %vm398_vm0, %v2138_v16  ;;  %v1683_v56 = vld [vmem:[#allocation9 + $0x4] ss:$0 sm:$0xff]  ;;  %v1681_v62 = vld [vmem:[#allocation9] ss:$0 sm:$0xff]  ;;  %v1684_v3 = vld [vmem:[#allocation9 + $0x3] ss:$0 sm:$0xff] }
  0x52   : > { %537 = vmatpush.msrb.mxu0 %v495_v17  ;;  %514 = vmatpush.msra.mxu3 %v494_v34 }
  0x53   : > { %455 = vmatpush.msrb.mxu1 %v432_v11 }
  0x54   : > { %538 = vmatpush.msrb.mxu0 %v493_v18  ;;  %515 = vmatpush.msra.mxu3 %v492_v35 }
  0x55   : > { %456 = vmatpush.msrb.mxu1 %v430_v12 }
  0x56   : > { %1532 = vmatmul.msk.f32.gmra.mxu2 %vm398_vm0, %v378_v13  ;;  %539 = vmatpush.msrb.mxu0 %v491_v19 }
  0x57   : > { %457 = vmatpush.msrb.mxu1 %v428_v14  ;;  %516 = vmatpush.msra.mxu3 %v490_v36 }
  0x58   : > { %1529 = vmatmul.msk.f32.vlgmr.msrb.gmra.mxu1 %vm398_vm0, %v377_v6  ;;  %540 = vmatpush.msrb.mxu0 %v489_v20 }
  0x59   : > { %1535 = vmatmul.msk.f32.vlgmr.msrb.gmra.mxu0 %vm398_vm0, %v379_v21  ;;  %517 = vmatpush.msra.mxu3 %v488_v37 }
  0x5a   : > { %1533 = vmatmul.msk.f32.vlgmr.msra.gmra.mxu3 %vm398_vm0, %v379_v21 }
  0x60   : > { %1530 = vmatmul.msk.f32.gmra.mxu1 %vm398_vm0, %v378_v13 }
  0x61   : > { %1536 = vmatmul.msk.f32.gmra.mxu0 %vm398_vm0, %v380_v24 }
  0x62   : > { %1534 = vmatmul.msk.f32.gmra.mxu3 %vm398_vm0, %v380_v24 }
  0xc1   : > { %v608_v41 = vpop.permute.xlu1 %607 }
  0xcd   : > { %v2157_v22 = vpop.f32.mrf.mxu1 }
  0xce   : > { %v422_v50 = vpop.f32.mrf.mxu0  ;;  %v2205_v1 = vadd.f32 %v1681_v62, %v2157_v22 }
  0xcf   : > { %v2196_v63 = vadd.f32 %v1681_v62, %v422_v50 }
  0xd1   : > { %v482_v23 = vpop.f32.mrf.mxu2 }
  0xd2   : > { %v566_v30 = vrot.slane %v482_v23, 1  ;;  %v591_v44 = vrot.slane %v482_v23, 2 }
  0xd5   : > { %v459_v26 = vpop.f32.mrf.mxu1 }
  0xd6   : > { %v551_v27 = vadd.f32 %v1682_v25, %v459_v26  ;;  %v542_v51 = vpop.f32.mrf.mxu0 }
  0xd7   : > { %v579_v54 = vrot.slane %v542_v51, 1  ;;  %v598_v17 = vrot.slane %v542_v51, 2 }
  0xd8   : > { %554 = vst.msk [vmem:[#allocation2] sm:$0xff] %vm553_vm1, %v551_v27 }
  0xd9   : > { %v485_v28 = vpop.f32.mrf.mxu2 }
  0xda   : > { %v567_v29 = vrot.slane %v485_v28, 1  ;;  %v592_v39 = vrot.slane %v485_v28, 2 }
  0xdc   : > { %571 = vrot.lane.b32.xlu0 %v567_v29, %s1896_s11  ;;  %v568_v31 = vsel %vm565_vm2, %v566_v30, %v567_v29  ;;  %v593_v47 = vsel %vm590_vm3, %v591_v44, %v592_v39  ;;  %v386_v44 = vld [vmem:[%s2438_s5 + $0x28] sm:$0xff] }
  0xdd   : > { %v462_v32 = vpop.f32.mrf.mxu1  ;;  %v519_v2 = vpop.f32.mrf.mxu3 }
  0xde   : > { %v552_v33 = vadd.f32 %v1682_v25, %v462_v32  ;;  %v545_v52 = vpop.f32.mrf.mxu0  ;;  %v557_v4 = vadd.f32 %v1684_v3, %v519_v2 }
  0xdf   : > { %v580_v53 = vrot.slane %v545_v52, 1  ;;  %v2198_v0 = vld [vmem:[#allocation2] sm:$0xff]  ;;  %v599_v18 = vrot.slane %v545_v52, 2 }
  0xe0   : > { %555 = vst.msk [vmem:[#allocation2 + $0x8] sm:$0xff] %vm553_vm1, %v552_v33 }
  0xe1   : > { %v581_v55 = vsel %vm565_vm2, %v579_v54, %v580_v53  ;;  %559 = vst.msk [vmem:[#allocation3] sm:$0xff] %vm553_vm1, %v557_v4  ;;  %v600_v21 = vsel %vm590_vm3, %v598_v17, %v599_v18 }
  0xe4   : > { %569 = vrot.lane.b32.xlu0 %v568_v31, %s1896_s11 }
  0xe5   : > { %v522_v5 = vpop.f32.mrf.mxu3 }
  0xe6   : > { %v558_v6 = vadd.f32 %v1684_v3, %v522_v5 }
  0xe7   : > { %v641_v61 = vld [vmem:[#allocation2 + $0x8] sm:$0xff] }
  0xe8   : > { %560 = vst.msk [vmem:[#allocation3 + $0x8] sm:$0xff] %vm553_vm1, %v558_v6 }
 0x14e   : > { %v572_v38 = vpop.permute.xlu0 %571 }
 0x14f   : > { %v576_v40 = vadd.f32 %v572_v38, %v462_v32 }
 0x151   : > { %v597_v42 = vadd.f32 %v592_v39, %v576_v40 }
 0x153   : > { %v611_v43 = vadd.f32 %v608_v41, %v597_v42 }
 0x155   : > { %616 = vrot.lane.b32.xlu1 %v611_v43, %s1896_s11  ;;  %v2244_v43 = vld [vmem:[#allocation3] sm:$0xff] }
 0x156   : > { %v570_v45 = vpop.permute.xlu0 %569 }
 0x157   : > { %v575_v46 = vadd.f32 %v570_v45, %v459_v26  ;;  %v385_v45 = vld [vmem:[%s2438_s5 + $0x20] sm:$0xff] }
 0x159   : > { %v596_v48 = vadd.f32 %v593_v47, %v575_v46 }
 0x15b   : > { %v610_v49 = vadd.f32 %v608_v41, %v596_v48  ;;  %v645_v41 = vld [vmem:[#allocation3 + $0x8] sm:$0xff] }
 0x15d   : > { %614 = vrot.lane.b32.xlu2 %v610_v49, %s1896_s11  ;;  %584 = vrot.lane.b32.xlu1 %v580_v53, %s1896_s11 }
 0x165   : > { %582 = vrot.lane.b32.xlu1 %v581_v55, %s1896_s11 }
 0x16d   : > { %625 = vrot.lane.b32.xlu1 %v1683_v56, %s1896_s11 }
 0x1b7   : > { %v615_v57 = vpop.permute.xlu2 %614 }
 0x1b8   : > { %620 = vst.msk [vmem:[#allocation2 + $0x10] sm:$0xff] %vm553_vm1, %v615_v57 }
 0x1bf   : > { %v2191_v60 = vld [vmem:[#allocation2 + $0x10] sm:$0xff] }
 0x1c7   : > { %v617_v58 = vpop.permute.xlu1 %616 }
 0x1c8   : > { %622 = vst.msk [vmem:[#allocation2 + $0x18] sm:$0x3f] %vm621_vm4, %v617_v58 }
 0x1cf   : > { %v643_v59 = vld [vmem:[#allocation2 + $0x18] sm:$0x3f]  ;;  %v585_v10 = vpop.permute.xlu1 %584 }
 0x1d0   : > { %1537 = vmatpush.xpose.msk.msra.mxu1 %vm648_vm5, %v643_v59  ;;  %v589_v15 = vadd.f32 %v585_v10, %v522_v5 }
 0x1d2   : > { %v604_v20 = vadd.f32 %v599_v18, %v589_v15 }
 0x1d4   : > { %1538 = vmatpush.xpose.msk.msra.mxu1 %vm648_vm5, %v2191_v60 }
 0x1d7   : > { %v583_v14 = vpop.permute.xlu1 %582 }
 0x1d8   : > { %1539 = vmatpush.xpose.msk.msra.mxu1 %vm648_vm5, %v641_v61  ;;  %v588_v19 = vadd.f32 %v583_v14, %v519_v2 }
 0x1da   : > { %v603_v23 = vadd.f32 %v600_v21, %v588_v19 }
 0x1dc   : > { %1540 = vmatpush.xpose.msk.msra.mxu1 %vm648_vm5, %v2198_v0 }
 0x1df   : > { %1541 = vmatmul.msk.f32.vlgmr.msra.gmra.mxu1 %vm648_vm5, %v2196_v63  ;;  %v626_v22 = vpop.permute.xlu1 %625 }
 0x1e0   : > { %v629_v24 = vadd.f32 %v626_v22, %v604_v20  ;;  %v628_v25 = vadd.f32 %v626_v22, %v603_v23 }
 0x1e7   : > { %1542 = vmatmul.msk.f32.gmra.mxu1 %vm648_vm5, %v2205_v1 }
 0x25c   : > { %v684_v7 = vpop.f32.mrf.mxu1 }
 0x25d   : > { %v690_v8 = vmul.f32 0.25, %v684_v7 }
 0x25f   : > { %v693_v9 = vsel %vm692_vm6, %v690_v8, -inf }
 0x260   : > { %694 = vmax.xlane.f32.xlu2 %v693_v9 }
 0x264   : > { %v687_v11 = vpop.f32.mrf.mxu1 }
 0x265   : > { %v691_v12 = vmul.f32 0.25, %v687_v11 }
 0x267   : > { %v696_v13 = vsel %vm692_vm6, %v691_v12, -inf }
 0x268   : > { %697 = vmax.xlane.f32.xlu0 %v696_v13 }
 0x278   : > { %634 = vrot.lane.b32.xlu2 %v629_v24, %s1896_s11 }
 0x27c   : > { %632 = vrot.lane.b32.xlu0 %v628_v25, %s1896_s11 }
 0x284   : > { %783 = vrot.lane.b32.xlu0 %v643_v59, %s1897_s26 }
 0x28c   : > { %779 = vrot.lane.b32.xlu0 %v641_v61, %s1897_s26 }
 0x294   : > { %777 = vrot.lane.b32.xlu0 %v2198_v0, %s1897_s26 }
 0x29c   : > { %1153 = vrot.lane.b32.xlu0 %v643_v59, %s1898_s15 }
 0x2a4   : > { %983 = vrot.lane.b32.xlu0 %v643_v59, %s1899_s22 }
 0x2ac   : > { %1149 = vrot.lane.b32.xlu0 %v641_v61, %s1898_s15 }
 0x2b4   : > { %979 = vrot.lane.b32.xlu0 %v641_v61, %s1899_s22 }
 0x2bc   : > { %1143 = vrot.lane.b32.xlu0 %v2196_v63, %s1898_s15 }
 0x2c4   : > { %1145 = vrot.lane.b32.xlu0 %v2205_v1, %s1898_s15 }
 0x2d3   : > { %v695_v26 = vpop.xlane.xlu2 %694 }
 0x2d4   : > { %v699_v27 = vsub.f32 %v690_v8, %v695_v26 }
 0x2d6   : > { %v701_v28 = vmul.f32 1.442695, %v699_v27 }
 0x2d8   : > { %1688 = vpow2.f32 %v701_v28 }
 0x2db   : > { %v635_v29 = vpop.permute.xlu2 %634  ;;  %v698_v30 = vpop.xlane.xlu0 %697 }
 0x2dc   : > { %639 = vst.msk [vmem:[#allocation3 + $0x18] sm:$0x3f] %vm621_vm4, %v635_v29  ;;  %v700_v31 = vsub.f32 %v691_v12, %v698_v30 }
 0x2de   : > { %v1689_v32 = vpop.eup %1688  ;;  %v703_v33 = vmul.f32 1.442695, %v700_v31 }
 0x2df   : > { %v705_v34 = vsel %vm692_vm6, %v1689_v32, 0.0 }
 0x2e0   : > { %1690 = vpow2.f32 %v703_v33  ;;  %706 = vadd.xlane.f32.xlu1 %v705_v34 }
 0x2e3   : > { %v2230_v35 = vld [vmem:[#allocation3 + $0x18] sm:$0x3f] }
 0x2e4   : > { %1543 = vmatpush.msk.msrb.mxu2 %vm590_vm3, %v2230_v35 }
 0x2e6   : > { %v2234_v36 = vpop.eup %1690 }
 0x2e7   : > { %v708_v37 = vsel %vm692_vm6, %v2234_v36, 0.0 }
 0x2e8   : > { %709 = vadd.xlane.f32.xlu2 %v708_v37 }
 0x2ee   : > { %v633_v38 = vpop.permute.xlu0 %632 }
 0x2ef   : > { %638 = vst.msk [vmem:[#allocation3 + $0x10] sm:$0xff] %vm553_vm1, %v633_v38 }
 0x2f6   : > { %v784_v39 = vpop.permute.xlu0 %783  ;;  %v646_v40 = vld [vmem:[#allocation3 + $0x10] sm:$0xff] }
 0x2f7   : > { %763 = vmatpush.msrb.mxu2 %v646_v40  ;;  %1546 = vmatpush.xpose.msk.msrb.mxu3 %vm648_vm5, %v784_v39  ;;  %v2240_v42 = vpack.i.bf16 %v645_v41, %v646_v40 }
 0x2f9   : > { %781 = vrot.lane.b32.xlu1 %v2191_v60, %s1897_s26  ;;  %764 = vmatpush.msrb.mxu2 %v645_v41 }
 0x2fb   : > { %765 = vmatpush.msrb.mxu2 %v2244_v43 }
 0x2fd   : > { %964 = vmatpush.msra.mxu2 %v386_v44 }
 0x2fe   : > { %v780_v46 = vpop.permute.xlu0 %779 }
 0x2ff   : > { %965 = vmatpush.msra.mxu2 %v385_v45 }
 0x300   : > { %1151 = vrot.lane.b32.xlu2 %v2191_v60, %s1898_s15 }
 0x301   : > { %773 = vrot.lane.b32.xlu1 %v2196_v63, %s1897_s26 }
 0x306   : > { %v778_v47 = vpop.permute.xlu0 %777 }
 0x308   : > { %977 = vrot.lane.b32.xlu2 %v2198_v0, %s1899_s22 }
 0x309   : > { %981 = vrot.lane.b32.xlu1 %v2191_v60, %s1899_s22 }
 0x30e   : > { %v1154_v50 = vpop.permute.xlu0 %1153 }
 0x310   : > { %975 = vrot.lane.b32.xlu2 %v2205_v1, %s1899_s22 }
 0x311   : > { %775 = vrot.lane.b32.xlu1 %v2205_v1, %s1897_s26 }
 0x319   : > { %1147 = vrot.lane.b32.xlu1 %v2198_v0, %s1898_s15 }
 0x321   : > { %973 = vrot.lane.b32.xlu1 %v2196_v63, %s1899_s22  ;;  %v984_v63 = vpop.permute.xlu0 %983 }
 0x329   : > { %v1150_v12 = vpop.permute.xlu0 %1149 }
 0x331   : > { %v980_v15 = vpop.permute.xlu0 %979 }
 0x339   : > { %v1144_v24 = vpop.permute.xlu0 %1143 }
 0x341   : > { %v1146_v28 = vpop.permute.xlu0 %1145 }
 0x353   : > { %v707_v48 = vpop.xlane.xlu1 %706 }
 0x354   : > { %1692 = vrcp.f32 %v707_v48  ;;  %v722_v54 = vand.u32 2147483648, %v707_v48  ;;  %v720_v56 = vand.u32 2147483647, %v707_v48  ;;  %vm716_vm8 = vweird.f32 %v707_v48 }
 0x356   : > { %v723_v59 = vor.u32 1.1754944e-38, %v722_v54  ;;  %vm721_vm10 = vcmp.eq.f32.partialorder %v720_v56, 8.507059e+37 }
 0x35a   : > { %v1693_v49 = vpop.eup %1692 }
 0x35b   : > { %v712_v51 = vmul.f32 %v1693_v49, %v707_v48  ;;  %v710_v52 = vpop.xlane.xlu2 %709  ;;  %vm717_vm7 = vweird.f32 %v1693_v49 }
 0x35c   : > { %1694 = vrcp.f32 %v710_v52  ;;  %vm718_vm9 = vmor %vm716_vm8, %vm717_vm7  ;;  %v737_v2 = vand.u32 2147483648, %v710_v52  ;;  %v735_v4 = vand.u32 2147483647, %v710_v52  ;;  %vm731_vm12 = vweird.f32 %v710_v52 }
 0x35d   : > { %v713_v53 = vsub.f32 1.0, %v712_v51 }
 0x35e   : > { %v738_v6 = vor.u32 1.1754944e-38, %v737_v2  ;;  %vm736_vm14 = vcmp.eq.f32.partialorder %v735_v4, 8.507059e+37 }
 0x35f   : > { %v714_v55 = vmul.f32 %v1693_v49, %v713_v53 }
 0x361   : > { %v715_v57 = vadd.f32 %v1693_v49, %v714_v55 }
 0x362   : > { %v1695_v58 = vpop.eup %1694 }
 0x363   : > { %v727_v60 = vmul.f32 %v1695_v58, %v710_v52  ;;  %v719_v61 = vsel %vm718_vm9, %v1693_v49, %v715_v57  ;;  %vm732_vm11 = vweird.f32 %v1695_v58  ;;  %v1152_v7 = vpop.permute.xlu2 %1151 }
 0x364   : > { %v724_v62 = vsel %vm721_vm10, %v723_v59, %v719_v61  ;;  %vm733_vm13 = vmor %vm731_vm12, %vm732_vm11 }
 0x365   : > { %v728_v0 = vsub.f32 1.0, %v727_v60  ;;  %v725_v1 = vmul.f32 %v1689_v32, %v724_v62 }
 0x367   : > { %v729_v3 = vmul.f32 %v1695_v58, %v728_v0  ;;  %1544 = vmatmul.msk.f32.vlgmr.msrb.gmra.mxu2 %vm692_vm6, %v725_v1 }
 0x368   : > { %1570 = vmatpush.xpose.msk.msrb.mxu2 %vm648_vm5, %v1154_v50 }
 0x369   : > { %v730_v5 = vadd.f32 %v1695_v58, %v729_v3 }
 0x36b   : > { %v782_v8 = vpop.permute.xlu1 %781  ;;  %v734_v9 = vsel %vm733_vm13, %v1695_v58, %v730_v5  ;;  %v978_v18 = vpop.permute.xlu2 %977 }
 0x36c   : > { %1571 = vmatpush.xpose.msk.msrb.mxu2 %vm648_vm5, %v1152_v7  ;;  %1547 = vmatpush.xpose.msk.msrb.mxu3 %vm648_vm5, %v782_v8  ;;  %v739_v10 = vsel %vm736_vm14, %v738_v6, %v734_v9 }
 0x36d   : > { %v740_v11 = vmul.f32 %v2234_v36, %v739_v10 }
 0x36f   : > { %1545 = vmatmul.msk.f32.gmra.mxu2 %vm692_vm6, %v740_v11 }
 0x370   : > { %1572 = vmatpush.xpose.msk.msrb.mxu2 %vm648_vm5, %v1150_v12  ;;  %1548 = vmatpush.xpose.msk.msrb.mxu3 %vm648_vm5, %v780_v46 }
 0x373   : > { %v774_v13 = vpop.permute.xlu1 %773  ;;  %v976_v21 = vpop.permute.xlu2 %975 }
 0x374   : > { %1549 = vmatpush.xpose.msk.msrb.mxu3 %vm648_vm5, %v778_v47 }
 0x377   : > { %1550 = vmatmul.msk.f32.vlgmr.msrb.gmra.mxu3 %vm648_vm5, %v774_v13 }
 0x378   : > { %1559 = vmatpush.xpose.msk.msra.mxu3 %vm648_vm5, %v984_v63 }
 0x37b   : > { %v982_v14 = vpop.permute.xlu1 %981 }
 0x37c   : > { %1560 = vmatpush.xpose.msk.msra.mxu3 %vm648_vm5, %v982_v14 }
 0x380   : > { %1561 = vmatpush.xpose.msk.msra.mxu3 %vm648_vm5, %v980_v15 }
 0x383   : > { %v776_v17 = vpop.permute.xlu1 %775 }
 0x384   : > { %1551 = vmatmul.msk.f32.gmra.mxu3 %vm648_vm5, %v776_v17 }
 0x385   : > { %1562 = vmatpush.xpose.msk.msra.mxu3 %vm648_vm5, %v978_v18 }
 0x38b   : > { %v1148_v19 = vpop.permute.xlu1 %1147 }
 0x38c   : > { %1573 = vmatpush.xpose.msk.msrb.mxu2 %vm648_vm5, %v1148_v19 }
 0x393   : > { %v974_v20 = vpop.permute.xlu1 %973 }
 0x394   : > { %1563 = vmatmul.msk.f32.vlgmr.msra.gmra.mxu3 %vm648_vm5, %v974_v20 }
 0x39c   : > { %1564 = vmatmul.msk.f32.gmra.mxu3 %vm648_vm5, %v976_v21 }
 0x3ea   : > { %v767_v22 = vpop.f32.mrf.mxu2 }
 0x3eb   : > { %1557 = vmatmul.msk.f32.vlgmr.msra.gmra.mxu2 %vm648_vm5, %v767_v22 }
 0x3f2   : > { %v770_v23 = vpop.f32.mrf.mxu2 }
 0x3f3   : > { %1558 = vmatmul.msk.f32.gmra.mxu2 %vm648_vm5, %v770_v23 }
 0x3fa   : > { %v814_v25 = vpop.f32.mrf.mxu3 }
 0x3fb   : > { %v820_v26 = vmul.f32 0.25, %v814_v25  ;;  %1574 = vmatmul.msk.f32.vlgmr.msrb.gmra.mxu2 %vm648_vm5, %v1144_v24 }
 0x3fd   : > { %v822_v27 = vsel %vm692_vm6, %v820_v26, -inf }
 0x3fe   : > { %823 = vmax.xlane.f32.xlu1 %v822_v27 }
 0x403   : > { %1575 = vmatmul.msk.f32.gmra.mxu2 %vm648_vm5, %v1146_v28 }
 0x407   : > { %v817_v29 = vpop.f32.mrf.mxu3 }
 0x408   : > { %v821_v30 = vmul.f32 0.25, %v817_v29 }
 0x40a   : > { %v825_v31 = vsel %vm692_vm6, %v821_v30, -inf }
 0x40b   : > { %826 = vmax.xlane.f32.xlu0 %v825_v31 }
 0x417   : > { %v1014_v32 = vpop.f32.mrf.mxu3 }
 0x418   : > { %v1020_v33 = vmul.f32 0.25, %v1014_v32 }
 0x41a   : > { %v1022_v34 = vsel %vm692_vm6, %v1020_v33, -inf }
 0x41b   : > { %1023 = vmax.xlane.f32.xlu1 %v1022_v34 }
 0x41f   : > { %v1017_v36 = vpop.f32.mrf.mxu3 }
 0x420   : > { %v1021_v37 = vmul.f32 0.25, %v1017_v36 }
 0x422   : > { %v1025_v38 = vsel %vm692_vm6, %v1021_v37, -inf }
 0x423   : > { %1026 = vmax.xlane.f32.xlu2 %v1025_v38 }
 0x434   : > { %879 = vrot.lane.b32.xlu1 %v2230_v35, %s1897_s26 }
 0x46e   : > { %v2297_v39 = vpop.f32.mrf.mxu2 }
 0x471   : > { %v824_v40 = vpop.xlane.xlu1 %823 }
 0x472   : > { %v828_v41 = vsub.f32 %v820_v26, %v824_v40 }
 0x474   : > { %v830_v44 = vmul.f32 1.442695, %v828_v41 }
 0x476   : > { %1696 = vpow2.f32 %v830_v44  ;;  %v2299_v45 = vpop.f32.mrf.mxu2 }
 0x47c   : > { %v2301_v46 = vpop.eup %1696 }
 0x47d   : > { %v834_v47 = vsel %vm692_vm6, %v2301_v46, 0.0 }
 0x47e   : > { %835 = vadd.xlane.f32.xlu1 %v834_v47  ;;  %v1184_v48 = vpop.f32.mrf.mxu2  ;;  %v827_v49 = vpop.xlane.xlu0 %826 }
 0x47f   : > { %v1190_v50 = vmul.f32 0.25, %v1184_v48  ;;  %v829_v51 = vsub.f32 %v821_v30, %v827_v49 }
 0x481   : > { %v832_v52 = vmul.f32 1.442695, %v829_v51  ;;  %v1192_v53 = vsel %vm692_vm6, %v1190_v50, -inf }
 0x482   : > { %1193 = vmax.xlane.f32.xlu2 %v1192_v53 }
 0x483   : > { %1698 = vpow2.f32 %v832_v52 }
 0x486   : > { %v1187_v56 = vpop.f32.mrf.mxu2 }
 0x487   : > { %v1191_v57 = vmul.f32 0.25, %v1187_v56 }
 0x489   : > { %v2306_v54 = vpop.eup %1698  ;;  %v1195_v61 = vsel %vm692_vm6, %v1191_v57, -inf }
 0x48a   : > { %v837_v55 = vsel %vm692_vm6, %v2306_v54, 0.0 }
 0x48b   : > { %838 = vadd.xlane.f32.xlu0 %v837_v55 }
 0x48e   : > { %v1024_v58 = vpop.xlane.xlu1 %1023 }
 0x48f   : > { %v1028_v59 = vsub.f32 %v1020_v33, %v1024_v58 }
 0x491   : > { %v1030_v60 = vmul.f32 1.442695, %v1028_v59 }
 0x493   : > { %1700 = vpow2.f32 %v1030_v60  ;;  %1196 = vmax.xlane.f32.xlu0 %v1195_v61 }
 0x496   : > { %v1027_v62 = vpop.xlane.xlu2 %1026 }
 0x497   : > { %v1029_v63 = vsub.f32 %v1021_v37, %v1027_v62 }
 0x499   : > { %v2311_v0 = vpop.eup %1700  ;;  %v1032_v1 = vmul.f32 1.442695, %v1029_v63 }
 0x49a   : > { %v1034_v2 = vsel %vm692_vm6, %v2311_v0, 0.0 }
 0x49b   : > { %1702 = vpow2.f32 %v1032_v1  ;;  %1035 = vadd.xlane.f32.xlu2 %v1034_v2  ;;  %v388_v2 = vld [vmem:[%s2438_s5 + $0x38] sm:$0xff] }
 0x49c   : > { %935 = vmatpush.msrb.mxu1 %v388_v2 }
 0x4a1   : > { %v2315_v3 = vpop.eup %1702 }
 0x4a2   : > { %v1037_v4 = vsel %vm692_vm6, %v2315_v3, 0.0 }
 0x4a3   : > { %1038 = vadd.xlane.f32.xlu1 %v1037_v4 }
 0x4a6   : > { %v880_v5 = vpop.permute.xlu1 %879 }
 0x4a7   : > { %1552 = vmatpush.msk.msra.mxu0 %vm590_vm3, %v880_v5  ;;  %1666 = vrot.lane.b32.xlu0 %v2240_v42, %s1897_s26 }
 0x4b3   : > { %873 = vrot.lane.b32.xlu2 %v2244_v43, %s1897_s26 }
 0x4bb   : > { %1246 = vrot.lane.b32.xlu2 %v2230_v35, %s1898_s15 }
 0x4bc   : > { %1070 = vrot.lane.b32.xlu1 %v2244_v43, %s1899_s22 }
 0x4c3   : > { %1671 = vrot.lane.b32.xlu2 %v2240_v42, %s1898_s15 }
 0x4cb   : > { %1076 = vrot.lane.b32.xlu2 %v2230_v35, %s1899_s22 }
 0x4f1   : > { %v836_v9 = vpop.xlane.xlu1 %835 }
 0x4f2   : > { %v851_v27 = vand.u32 2147483648, %v836_v9  ;;  %vm845_vm1 = vweird.f32 %v836_v9  ;;  %v849_v29 = vand.u32 2147483647, %v836_v9 }
 0x4f4   : > { %v852_v33 = vor.u32 1.1754944e-38, %v851_v27  ;;  %vm850_vm4 = vcmp.eq.f32.partialorder %v849_v29, 8.507059e+37 }
 0x4f5   : > { %v1194_v6 = vpop.xlane.xlu2 %1193 }
 0x4f6   : > { %v1198_v7 = vsub.f32 %v1190_v50, %v1194_v6 }
 0x4f8   : > { %v1200_v8 = vmul.f32 1.442695, %v1198_v7 }
 0x4fa   : > { %1704 = vpow2.f32 %v1200_v8 }
 0x4fb   : > { %1706 = vrcp.f32 %v836_v9 }
 0x4fe   : > { %v839_v10 = vpop.xlane.xlu0 %838 }
 0x4ff   : > { %1708 = vrcp.f32 %v839_v10  ;;  %v866_v40 = vand.u32 2147483648, %v839_v10  ;;  %vm860_vm8 = vweird.f32 %v839_v10  ;;  %v864_v47 = vand.u32 2147483647, %v839_v10 }
 0x500   : > { %v2332_v11 = vpop.eup %1704 }
 0x501   : > { %v1204_v12 = vsel %vm692_vm6, %v2332_v11, 0.0  ;;  %v1707_v13 = vpop.eup %1706  ;;  %v867_v48 = vor.u32 1.1754944e-38, %v866_v40  ;;  %vm865_vm10 = vcmp.eq.f32.partialorder %v864_v47, 8.507059e+37 }
 0x502   : > { %1205 = vadd.xlane.f32.xlu2 %v1204_v12  ;;  %v841_v17 = vmul.f32 %v1707_v13, %v836_v9  ;;  %vm846_vm15 = vweird.f32 %v1707_v13  ;;  %v387_v9 = vld [vmem:[%s2438_s5 + $0x30] sm:$0xff] }
 0x503   : > { %vm847_vm2 = vmor %vm845_vm1, %vm846_vm15  ;;  %936 = vmatpush.msrb.mxu1 %v387_v9 }
 0x504   : > { %v842_v35 = vsub.f32 1.0, %v841_v17 }
 0x505   : > { %v1709_v19 = vpop.eup %1708 }
 0x506   : > { %v1197_v14 = vpop.xlane.xlu0 %1196  ;;  %v843_v22 = vmul.f32 %v1707_v13, %v842_v35  ;;  %v856_v23 = vmul.f32 %v1709_v19, %v839_v10  ;;  %vm861_vm7 = vweird.f32 %v1709_v19 }
 0x507   : > { %v1199_v15 = vsub.f32 %v1191_v57, %v1197_v14  ;;  %vm862_vm9 = vmor %vm860_vm8, %vm861_vm7 }
 0x508   : > { %v844_v25 = vadd.f32 %v1707_v13, %v843_v22  ;;  %v857_v26 = vsub.f32 1.0, %v856_v23 }
 0x509   : > { %v1202_v18 = vmul.f32 1.442695, %v1199_v15 }
 0x50a   : > { %v848_v30 = vsel %vm847_vm2, %v1707_v13, %v844_v25  ;;  %v858_v31 = vmul.f32 %v1709_v19, %v857_v26  ;;  %v390_v25 = vld [vmem:[%s2438_s5 + $0x48] sm:$0xff] }
 0x50b   : > { %1710 = vpow2.f32 %v1202_v18  ;;  %v853_v36 = vsel %vm850_vm4, %v852_v33, %v848_v30  ;;  %1132 = vmatpush.msra.mxu1 %v390_v25 }
 0x50c   : > { %v859_v38 = vadd.f32 %v1709_v19, %v858_v31  ;;  %v854_v44 = vmul.f32 %v2301_v46, %v853_v36 }
 0x50e   : > { %v2336_v20 = vpop.xlane.xlu2 %1035 }
 0x50f   : > { %1712 = vrcp.f32 %v2336_v20  ;;  %v1051_v63 = vand.u32 2147483648, %v2336_v20  ;;  %v1049_v1 = vand.u32 2147483647, %v2336_v20 }
 0x511   : > { %v2338_v21 = vpop.eup %1710  ;;  %v1052_v7 = vor.u32 1.1754944e-38, %v1051_v63  ;;  %vm1050_vm13 = vcmp.eq.f32.partialorder %v1049_v1, 8.507059e+37 }
 0x512   : > { %v1207_v24 = vsel %vm692_vm6, %v2338_v21, 0.0 }
 0x513   : > { %1208 = vadd.xlane.f32.xlu0 %v1207_v24 }
 0x515   : > { %v1713_v56 = vpop.eup %1712 }
 0x516   : > { %v874_v28 = vpop.permute.xlu2 %873  ;;  %v1039_v55 = vpop.xlane.xlu1 %1038  ;;  %v1041_v57 = vmul.f32 %v1713_v56, %v2336_v20  ;;  %vm1046_vm11 = vweird.f32 %v1713_v56 }
 0x517   : > { %1714 = vrcp.f32 %v1039_v55  ;;  %v1066_v15 = vand.u32 2147483648, %v1039_v55  ;;  %vm1060_vm15 = vweird.f32 %v1039_v55 }
 0x518   : > { %v1042_v58 = vsub.f32 1.0, %v1041_v57 }
 0x519   : > { %v1667_v32 = vpop.permute.xlu0 %1666  ;;  %v1067_v22 = vor.u32 1.1754944e-38, %v1066_v15 }
 0x51a   : > { %v1668_v34 = vunpack.i.l.bf16 %v1667_v32  ;;  %1676 = vrot.lane.b32.xlu2 %v2240_v42, %s1899_s22  ;;  %v1669_v37 = vunpack.i.h.bf16 %v1667_v32  ;;  %v863_v42 = vsel %vm862_vm9, %v1709_v19, %v859_v38  ;;  %v1064_v19 = vand.u32 2147483647, %v1039_v55 }
 0x51b   : > { %v868_v49 = vsel %vm865_vm10, %v867_v48, %v863_v42 }
 0x51c   : > { %905 = vmatpush.msra.mxu0 %v1668_v34  ;;  %v869_v52 = vmul.f32 %v2306_v54, %v868_v49  ;;  %vm1065_vm2 = vcmp.eq.f32.partialorder %v1064_v19, 8.507059e+37 }
 0x51d   : > { %v1715_v59 = vpop.eup %1714 }
 0x51e   : > { %v1247_v41 = vpop.permute.xlu2 %1246  ;;  %906 = vmatpush.msra.mxu0 %v1669_v37  ;;  %v1056_v60 = vmul.f32 %v1715_v59, %v1039_v55  ;;  %vm1061_vm14 = vweird.f32 %v1715_v59 }
 0x51f   : > { %1576 = vmatpush.msk.msrb.mxu3 %vm590_vm3, %v1247_v41  ;;  %vm1062_vm1 = vmor %vm1060_vm15, %vm1061_vm14 }
 0x520   : > { %907 = vmatpush.msra.mxu0 %v874_v28  ;;  %v1057_v62 = vsub.f32 1.0, %v1056_v60 }
 0x521   : > { %1553 = vmatmul.msk.f32.vlgmr.msra.gmra.mxu0 %vm692_vm6, %v854_v44 }
 0x522   : > { %v1058_v5 = vmul.f32 %v1715_v59, %v1057_v62 }
 0x524   : > { %v1059_v14 = vadd.f32 %v1715_v59, %v1058_v5 }
 0x526   : > { %v1672_v50 = vpop.permute.xlu2 %1671 }
 0x527   : > { %v1673_v51 = vunpack.i.l.bf16 %v1672_v50  ;;  %1240 = vrot.lane.b32.xlu0 %v2244_v43, %s1898_s15  ;;  %v1674_v53 = vunpack.i.h.bf16 %v1672_v50  ;;  %v1043_v43 = vmul.f32 %v1713_v56, %v1042_v58 }
 0x529   : > { %1554 = vmatmul.msk.f32.gmra.mxu0 %vm692_vm6, %v869_v52  ;;  %1272 = vmatpush.msrb.mxu3 %v1673_v51  ;;  %v1044_v61 = vadd.f32 %v1713_v56, %v1043_v43 }
 0x52b   : > { %1273 = vmatpush.msrb.mxu3 %v1674_v53  ;;  %v392_v53 = vld [vmem:[%s2438_s5 + $0x58] sm:$0xff] }
 0x52e   : > { %v1077_v46 = vpop.permute.xlu2 %1076  ;;  %v1071_v17 = vpop.permute.xlu1 %1070 }
 0x52f   : > { %1565 = vmatpush.msk.msrb.mxu0 %vm590_vm3, %v1077_v46  ;;  %vm1045_vm3 = vweird.f32 %v2336_v20  ;;  %v1063_v20 = vsel %vm1062_vm1, %v1715_v59, %v1059_v14  ;;  %v391_v46 = vld [vmem:[%s2438_s5 + $0x50] sm:$0xff]  ;;  %v1900_v14 = vmov 32.0  }
 0x530   : > { %vm1047_vm12 = vmor %vm1045_vm3, %vm1046_vm11  ;;  %v1068_v26 = vsel %vm1065_vm2, %v1067_v22, %v1063_v20 }
 0x531   : > { %v1048_v4 = vsel %vm1047_vm12, %v1713_v56, %v1044_v61  ;;  %v1685_v61 = vld [vmem:[#allocation9 + $0x5] ss:$0 sm:$0xff] }
 0x532   : > { %v1053_v12 = vsel %vm1050_vm13, %v1052_v7, %v1048_v4 }
 0x533   : > { %v1054_v35 = vmul.f32 %v2311_v0, %v1053_v12  ;;  %v1069_v0 = vmul.f32 %v2315_v3, %v1068_v26  ;;  %v1726_v12 = vld [vmem:[%s2114_s20 + $0x8] sm:$0xff]  ;;  %s1589_s20 = sshll.u32 %s1964_s28, 4  ;;  %s1378_s28 = scalar_lea.sflag [#allocation6], %s2062_s24 }
 0x534   : > { %s1389_s19 = scalar_lea.hbm %s2440_s7, %s1589_s20 }
 0x535   : > { %s1392_s18 = sshll.u32 %s1389_s19, 4  ;;  %s1393_s18 = int_to_ptr.hbm [resolvable:$true] %s1392_s18 }
 0x536   : > { %s1831_s8 = sshra.s32 %s1393_s18, 4  ;;  %s1832_s8 = int_to_ptr.hbm [resolvable:$true] %s1831_s8 }
 0x537   : > { %s1833_s21 = scalar_lea.hbm %s1832_s8, 16  ;;  %p1838_p8 = scmp.lt.s32.totalorder %s1832_s8, %s2440_s7 }
 0x538   : > { %p1834_p4 = scmp.ne.s32.totalorder %s1832_s8, %s1833_s21  ;;  %p1839_p0 = scmp.lt.s32.totalorder %s1837_s12, %s1833_s21 }
 0x53a   : > { %p1835_p6 = pnand %p1834_p4, %p1995_p11  ;;  %p1840_p5 = por %p1839_p0, %p1838_p8 }
 0x53c   : > { %p1836_p7 = pneg %p1835_p6 }
 0x53e   : > { %p1841_p9 = pnand %p1840_p5, %p1836_p7 }
 0x575   : > { %v1206_v54 = vpop.xlane.xlu2 %1205 }
 0x576   : > { %1716 = vrcp.f32 %v1206_v54  ;;  %v1221_v31 = vand.u32 2147483648, %v1206_v54  ;;  %vm1215_vm7 = vweird.f32 %v1206_v54  ;;  %v1219_v33 = vand.u32 2147483647, %v1206_v54 }
 0x578   : > { %v1222_v37 = vor.u32 1.1754944e-38, %v1221_v31  ;;  %vm1220_vm9 = vcmp.eq.f32.partialorder %v1219_v33, 8.507059e+37 }
 0x57c   : > { %v1717_v10 = vpop.eup %1716 }
 0x57d   : > { %v1677_v6 = vpop.permute.xlu2 %1676  ;;  %v1211_v18 = vmul.f32 %v1717_v10, %v1206_v54  ;;  %vm1216_vm4 = vweird.f32 %v1717_v10 }
 0x57e   : > { %v1678_v8 = vunpack.i.l.bf16 %v1677_v6  ;;  %v1679_v13 = vunpack.i.h.bf16 %v1677_v6  ;;  %vm1217_vm8 = vmor %vm1215_vm7, %vm1216_vm4 }
 0x57f   : > { %v1212_v24 = vsub.f32 1.0, %v1211_v18 }
 0x580   : > { %1102 = vmatpush.msrb.mxu0 %v1678_v8 }
 0x581   : > { %v1213_v27 = vmul.f32 %v1717_v10, %v1212_v24 }
 0x582   : > { %1103 = vmatpush.msrb.mxu0 %v1679_v13 }
 0x583   : > { %v1214_v30 = vadd.f32 %v1717_v10, %v1213_v27 }
 0x584   : > { %1104 = vmatpush.msrb.mxu0 %v1071_v17 }
 0x585   : > { %1566 = vmatmul.msk.f32.vlgmr.msrb.gmra.mxu0 %vm692_vm6, %v1054_v35  ;;  %v1218_v34 = vsel %vm1217_vm8, %v1717_v10, %v1214_v30 }
 0x586   : > { %v1209_v23 = vpop.xlane.xlu0 %1208  ;;  %v1223_v38 = vsel %vm1220_vm9, %v1222_v37, %v1218_v34  ;;  %1302 = vmatpush.msra.mxu0 %v392_v53 }
 0x587   : > { %1718 = vrcp.f32 %v1209_v23  ;;  %v1236_v41 = vand.u32 2147483648, %v1209_v23  ;;  %vm1230_vm11 = vweird.f32 %v1209_v23  ;;  %v1224_v44 = vmul.f32 %v2332_v11, %v1223_v38  ;;  %v389_v11 = vld [vmem:[%s2438_s5 + $0x40] sm:$0xff] }
 0x588   : > { %v1234_v47 = vand.u32 2147483647, %v1209_v23  ;;  %1133 = vmatpush.msra.mxu1 %v389_v11  ;;  %1303 = vmatpush.msra.mxu0 %v391_v46  ;;  %1720 = vrcp.f32 %v1900_v14 }
 0x589   : > { %v1237_v48 = vor.u32 1.1754944e-38, %v1236_v41 }
 0x58a   : > { %vm1235_vm12 = vcmp.eq.f32.partialorder %v1234_v47, 8.507059e+37 }
 0x58d   : > { %v1719_v28 = vpop.eup %1718  ;;  %1567 = vmatmul.msk.f32.gmra.mxu0 %vm692_vm6, %v1069_v0 }
 0x58e   : > { %v1226_v29 = vmul.f32 %v1719_v28, %v1209_v23  ;;  %vm1231_vm10 = vweird.f32 %v1719_v28  ;;  %v1721_v15 = vpop.eup %1720 }
 0x58f   : > { %vm1232_vm3 = vmor %vm1230_vm11, %vm1231_vm10  ;;  %v1325_v17 = vmul.f32 32.0, %v1721_v15 }
 0x590   : > { %v1227_v32 = vsub.f32 1.0, %v1226_v29 }
 0x591   : > { %v1326_v18 = vsub.f32 1.0, %v1325_v17 }
 0x592   : > { %v1228_v36 = vmul.f32 %v1719_v28, %v1227_v32 }
 0x594   : > { %v1229_v40 = vadd.f32 %v1719_v28, %v1228_v36 }
 0x596   : > { %v1233_v42 = vsel %vm1232_vm3, %v1719_v28, %v1229_v40 }
 0x597   : > { %v1238_v50 = vsel %vm1235_vm12, %v1237_v48, %v1233_v42  ;;  %v1686_v42 = vld [vmem:[#allocation9 + $0x6] ss:$0 sm:$0xff] }
 0x598   : > { %v1239_v51 = vmul.f32 %v2338_v21, %v1238_v50  ;;  %v1687_v50 = vld [vmem:[#allocation9 + $0x7] ss:$0 sm:$0xff] }
 0x599   : > { %v1241_v3 = vpop.permute.xlu0 %1240 }
 0x59a   : > { %1274 = vmatpush.msrb.mxu3 %v1241_v3 }
 0x59b   : > { %1577 = vmatmul.msk.f32.vlgmr.msrb.gmra.mxu3 %vm692_vm6, %v1224_v44 }
 0x59e   : > { %v909_v49 = vpop.f32.mrf.mxu0 }
 0x59f   : > { %1555 = vmatmul.msk.f32.vlgmr.msrb.gmra.mxu1 %vm648_vm5, %v909_v49 }
 0x5a3   : > { %1578 = vmatmul.msk.f32.gmra.mxu3 %vm692_vm6, %v1239_v51 }
 0x5a6   : > { %v912_v52 = vpop.f32.mrf.mxu0 }
 0x5a7   : > { %1556 = vmatmul.msk.f32.gmra.mxu1 %vm648_vm5, %v912_v52 }
 0x602   : > { %v1106_v21 = vpop.f32.mrf.mxu0 }
 0x603   : > { %1568 = vmatmul.msk.f32.vlgmr.msra.gmra.mxu1 %vm648_vm5, %v1106_v21 }
 0x60a   : > { %v1109_v55 = vpop.f32.mrf.mxu0 }
 0x60b   : > { %1569 = vmatmul.msk.f32.gmra.mxu1 %vm648_vm5, %v1109_v55 }
 0x61c   : > { %v938_v58 = vpop.f32.mrf.mxu1 }
 0x61d   : > { %v968_v60 = vadd.f32 %v2297_v39, %v938_v58 }
 0x61e   : > { %v1276_v56 = vpop.f32.mrf.mxu3 }
 0x61f   : > { %1579 = vmatmul.msk.f32.vlgmr.msra.gmra.mxu0 %vm648_vm5, %v1276_v56 }
 0x624   : > { %v941_v59 = vpop.f32.mrf.mxu1 }
 0x625   : > { %v971_v4 = vadd.f32 %v2299_v45, %v941_v59  ;;  %v1327_v45 = vmul.f32 %v1721_v15, %v1326_v18 }
 0x626   : > { %v1279_v57 = vpop.f32.mrf.mxu3 }
 0x627   : > { %1580 = vmatmul.msk.f32.gmra.mxu0 %vm648_vm5, %v1279_v57  ;;  %v1328_v35 = vadd.f32 %v1721_v15, %v1327_v45  ;;  %vm1329_vm5 = vweird.f32 %v1721_v15 }
 0x680   : > { %v1135_v43 = vpop.f32.mrf.mxu1 }
 0x681   : > { %v1141_v54 = vadd.f32 %v1135_v43, %v968_v60 }
 0x688   : > { %v1138_v2 = vpop.f32.mrf.mxu1 }
 0x689   : > { %v1142_v6 = vadd.f32 %v1138_v2, %v971_v4 }
 0x69c   : > { %v1305_v62 = vpop.f32.mrf.mxu0 }
 0x69d   : > { %v1311_v63 = vadd.f32 %v1305_v62, %v1141_v54 }
 0x69f   : > { %v1314_v1 = vadd.f32 %v1685_v61, %v1311_v63 }
 0x6a1   : > { %v1316_v5 = vadd.f32 %v1314_v1, %v2138_v16  ;;  %v1330_v16 = vsel %vm1329_vm5, %v1721_v15, %v1328_v35 }
 0x6a3   : > { %v1318_v7 = vsel %vm398_vm0, %v1316_v5, 0.0 }
 0x6a4   : > { %v1308_v8 = vpop.f32.mrf.mxu0  ;;  %1319 = vadd.xlane.f32.xlu2 %v1318_v7 }
 0x6a5   : > { %v1312_v9 = vadd.f32 %v1308_v8, %v1142_v6 }
 0x6a7   : > { %v1315_v10 = vadd.f32 %v1685_v61, %v1312_v9 }
 0x6a9   : > { %v1317_v13 = vadd.f32 %v1726_v12, %v1315_v10 }
 0x6ab   : > { %v1321_v39 = vsel %vm398_vm0, %v1317_v13, 0.0 }
 0x6ac   : > { %1322 = vadd.xlane.f32.xlu0 %v1321_v39 }
 0x717   : > { %v1320_v19 = vpop.xlane.xlu2 %1319 }
 0x718   : > { %v1331_v20 = vmul.f32 %v1330_v16, %v1320_v19 }
 0x71a   : > { %v1333_v22 = vsub.f32 %v1316_v5, %v1331_v20 }
 0x71c   : > { %v1335_v23 = vmul.f32 %v1333_v22, %v1333_v22 }
 0x71e   : > { %v1337_v24 = vsel %vm398_vm0, %v1335_v23, 0.0 }
 0x71f   : > { %1338 = vadd.xlane.f32.xlu1 %v1337_v24  ;;  %v1323_v25 = vpop.xlane.xlu0 %1322 }
 0x720   : > { %v1332_v26 = vmul.f32 %v1330_v16, %v1323_v25 }
 0x722   : > { %v1334_v27 = vsub.f32 %v1317_v13, %v1332_v26 }
 0x724   : > { %v1336_v0 = vmul.f32 %v1334_v27, %v1334_v27 }
 0x726   : > { %v1340_v28 = vsel %vm398_vm0, %v1336_v0, 0.0 }
 0x727   : > { %1341 = vadd.xlane.f32.xlu2 %v1340_v28 }
 0x792   : > { %v1339_v29 = vpop.xlane.xlu1 %1338 }
 0x793   : > { %v1343_v30 = vmul.f32 %v1339_v29, %v1330_v16 }
 0x795   : > { %v1345_v31 = vadd.f32 1e-12, %v1343_v30 }
 0x797   : > { %1722 = vrsqrt.f32 %v1345_v31  ;;  %vm1353_vm13 = vweird.f32 %v1345_v31 }
 0x79a   : > { %v1342_v32 = vpop.xlane.xlu2 %1341 }
 0x79b   : > { %v1344_v33 = vmul.f32 %v1342_v32, %v1330_v16 }
 0x79d   : > { %v1723_v34 = vpop.eup %1722  ;;  %v1346_v36 = vadd.f32 1e-12, %v1344_v33 }
 0x79e   : > { %v1348_v37 = vmul.f32 %v1723_v34, %v1345_v31  ;;  %vm1354_vm6 = vweird.f32 %v1723_v34 }
 0x79f   : > { %1724 = vrsqrt.f32 %v1346_v36  ;;  %vm1355_vm14 = vmor %vm1353_vm13, %vm1354_vm6  ;;  %vm1363_vm1 = vweird.f32 %v1346_v36 }
 0x7a0   : > { %v1349_v38 = vmul.f32 %v1723_v34, %v1348_v37 }
 0x7a2   : > { %v1350_v40 = vmul.f32 0.5, %v1349_v38 }
 0x7a4   : > { %v1351_v41 = vsub.f32 1.5, %v1350_v40 }
 0x7a5   : > { %v1725_v3 = vpop.eup %1724 }
 0x7a6   : > { %v1352_v44 = vmul.f32 %v1723_v34, %v1351_v41  ;;  %v1358_v47 = vmul.f32 %v1725_v3, %v1346_v36  ;;  %vm1364_vm15 = vweird.f32 %v1725_v3 }
 0x7a7   : > { %vm1365_vm2 = vmor %vm1363_vm1, %vm1364_vm15 }
 0x7a8   : > { %v1356_v48 = vsel %vm1355_vm14, %v1723_v34, %v1352_v44  ;;  %v1359_v49 = vmul.f32 %v1725_v3, %v1358_v47 }
 0x7a9   : > { %v1367_v51 = vmul.f32 %v1356_v48, %v1333_v22 }
 0x7aa   : > { %v1360_v52 = vmul.f32 0.5, %v1359_v49 }
 0x7ab   : > { %v1370_v11 = vmul.f32 %v1686_v42, %v1367_v51 }
 0x7ac   : > { %v1361_v53 = vsub.f32 1.5, %v1360_v52 }
 0x7ad   : > { %v1373_v46 = vadd.f32 %v1687_v50, %v1370_v11 }
 0x7ae   : > { %v1362_v21 = vmul.f32 %v1725_v3, %v1361_v53 }
 0x7af   : > { %1375 = vst.msk [vmem:[%s369_s10] sm:$0xff] %vm398_vm0, %v1373_v46 }
 0x7b0   : > { %v1366_v55 = vsel %vm1365_vm2, %v1725_v3, %v1362_v21 }
 0x7b1   : > { %v1368_v56 = vmul.f32 %v1366_v55, %v1334_v27 }
 0x7b3   : > { %v1371_v57 = vmul.f32 %v1686_v42, %v1368_v56 }
 0x7b5   : > { %v1374_v58 = vadd.f32 %v1687_v50, %v1371_v57 }
 0x7b7   : > { %1376 = vst.msk [vmem:[%s369_s10 + $0x8] sm:$0xff] %vm398_vm0, %v1374_v58 }
 0x7b8   : > { %1844 = shalt.err (!%p1841_p9)
}
 0x7b9   : > { %s1901_s24 = smov 128   ;;  %s1902_s30 = smov 8  }
 0x7ba   : > { %1602 = dma.vmem_to_hbm [thread:$0]  (%p1995_p11), %s1391_s9, 256, %s1393_s18, %s1378_s28, %s1901_s24, %s1901_s24, %s1902_s30  }
 0x7bb PF: > { %s2459_s14 = sld [smem:[#allocation15_spill]]  ;;  %p2461_p10 = scmp.ge.s32.totalorder %s1891_s27, 2 }
 0x7bd   : > { %p1616_p1 = pnand %p2461_p10, %p1999_p12 }
 0x7bf   : > { %p1617_p2 = pneg %p1616_p1 }
 0x7c1   : > { %s1407_s26 = sand.u32 1, %s2459_s14  }
 0x7c2   : > { %s1408_s15 = scalar_lea.sflag [#allocation6], %s1407_s26 }
 0x7c3   : > { %1874 = dma.done.wait (%p1617_p2), %s1408_s15, 256  }
 0x7c4   : > { %1876 = vsyncadd (%p1617_p2), %s1408_s15, 4294967040  ;;  %s2462_s27 = sld [smem:[#allocation17_spill]]  ;;  %s2465_s24 = smov %s1883_s25 }
 0x7c5   : > { %s2463_s20 = sld [smem:[#allocation16_spill]] }
 0x7c6   : > { %s2464_s26 = sld [smem:[#allocation18_spill]] }
 0x7ca   : > { %p23_p3 = scmp.ge.s32.totalorder %s2462_s27, 4  }
 0x7cb   : > { %s2466_s25 = smov %s2463_s20 }
 0x7cc   :  { %25 = sbr.rel (!%p23_p3) target bundleno = 9 (0x9), region = 113 }
 0x7d1   :  { %1414 = vsyncpa [#allocation5], 1 }
 0x7d2   :  { %1416 = vsyncpa [#allocation5 + $0x1], 1 }
 0x7d3   :  { %1417 = vsyncpa [#allocation8], 1 }
 0x7d4   :  { %1419 = vsyncpa [#allocation8 + $0x1], 1 }
 0x7d5   :  { %1420 = vsyncpa [#allocation6], 1 }
 0x7d6   :  { %1422 = vsyncpa [#allocation6 + $0x1], 1 }

</bundles_post_ra>
